<compile_context>
chip_gen: v7x
topology: tpu7x:2x2x1
jax: 0.10.0
libtpu: 0.0.40
codegen_flags: <defaults>
</compile_context>

<pallas_src>
import jax
import jax.numpy as jnp
from jax import lax
from jax.experimental import pallas as pl
from jax.experimental.pallas import tpu as pltpu

MARGIN = 1.0          # losses.margin_loss margin
REGULARIZER = 0.01    # self.regularizer > 0 path
_EPS_SQ = 1e-24       # F.normalize eps=1e-12, applied on the squared norm


def _l2_normalize(x):
    """F.normalize(x, dim=-1): x / max(||x||_2, 1e-12), via rsqrt (EUP slot)."""
    ss = jnp.sum(x * x, axis=-1, keepdims=True)
    return x * lax.rsqrt(jnp.maximum(ss, _EPS_SQ))


def _loss_kernel(nidx_ref,                        # SMEM (B*N*2,) i32  (scalar prefetch)
                 heads_ref, tails_ref, rel_ref,   # VMEM (TB, Dp) f32  raw embeddings
                 ent_ref,                         # VMEM (2B, Dp) f32  raw flat entity table (resident)
                 part_ref,                        # VMEM (1, 8, 128) f32 per-tile partials
                 negh_ref, negt_ref):             # VMEM (TB, N, Dp) f32 scratch
    i = pl.program_id(0)
    TB, Dp = heads_ref.shape
    N = negh_ref.shape[1]

    # ---- fused F.normalize (encode_entity / encode_relation) ----
    h = _l2_normalize(heads_ref[...])             # (TB, Dp)
    t = _l2_normalize(tails_ref[...])
    r = _l2_normalize(rel_ref[...])

    # ---- positive TransE scores: -||h + r - t||_1 ----
    pos = -jnp.sum(jnp.abs(h + r - t), axis=-1, keepdims=True)        # (TB, 1)

    # ---- l2_regularization partial: sums of squares (means taken in wrapper) ----
    sq_sum = jnp.sum(h * h) + jnp.sum(t * t) + jnp.sum(r * r)

    # ---- negative-pair gather: dynamic row slices of the resident raw table,
    #      indices scalar-prefetched into SMEM (no one-hot matmul) ----
    base = i * (TB * N * 2)
    for b in range(TB):            # static unrolled: TB*N is small and fixed
        for j in range(N):
            off = base + (b * N + j) * 2
            hidx = nidx_ref[off]
            tidx = nidx_ref[off + 1]
            negh_ref[pl.ds(b, 1), pl.ds(j, 1), :] = (
                ent_ref[pl.ds(hidx, 1), :].reshape(1, 1, Dp))
            negt_ref[pl.ds(b, 1), pl.ds(j, 1), :] = (
                ent_ref[pl.ds(tidx, 1), :].reshape(1, 1, Dp))

    nh = _l2_normalize(negh_ref[...])             # (TB, N, Dp)
    nt = _l2_normalize(negt_ref[...])
    neg = -jnp.sum(jnp.abs(nh + r[:, None, :] - nt), axis=-1)         # (TB, N)

    # ---- margin loss partial: sum(relu(margin - pos + neg)) ----
    hinge_sum = jnp.sum(jnp.maximum(MARGIN - pos + neg, 0.0))

    # ---- lane-dense partial block: [0,0,0]=hinge sum, [0,0,1]=sq sum ----
    sub = lax.broadcasted_iota(jnp.int32, part_ref.shape, 1)
    lane = lax.broadcasted_iota(jnp.int32, part_ref.shape, 2)
    blk = jnp.where((sub == 0) & (lane == 0), hinge_sum, 0.0)
    blk = jnp.where((sub == 0) & (lane == 1), sq_sum, blk)
    part_ref[...] = blk


def link_prediction_loss(ent_embs, rel_embs, neg_idx):
    """encode (F.normalize) + compute_loss (transe + margin + l2 reg)."""
    ent_embs = ent_embs.astype(jnp.float32)       # (B, 2, D)
    rel_embs = rel_embs.astype(jnp.float32)       # (B, 1, D)
    B, _, D = ent_embs.shape
    N = neg_idx.shape[1]

    # Lane-dense pre-shaping (free XLA layout work; keeps the kernel relayout-free).
    heads = ent_embs[:, 0, :]                     # (B, D)
    tails = ent_embs[:, 1, :]                     # (B, D)
    rel = rel_embs[:, 0, :]                       # (B, D)
    ent_flat = ent_embs.reshape(2 * B, D)         # (2B, D): row 2b=head_b, 2b+1=tail_b

    Dp = ((D + 127) // 128) * 128                 # pad embedding dim to full lanes
    if Dp != D:
        pad = ((0, 0), (0, Dp - D))               # zero-pad: exact for norm/L1/sum-sq
        heads, tails, rel, ent_flat = [
            jnp.pad(a, pad) for a in (heads, tails, rel, ent_flat)]

    TB = 8 if B % 8 == 0 else B                   # sublane-aligned batch tile
    num_tiles = B // TB
    nidx_flat = neg_idx.astype(jnp.int32).reshape(-1)   # (B*N*2,) -> SMEM prefetch

    grid_spec = pltpu.PrefetchScalarGridSpec(
        num_scalar_prefetch=1,
        grid=(num_tiles,),
        in_specs=[
            pl.BlockSpec((TB, Dp), lambda i, nidx: (i, 0)),      # heads tile
            pl.BlockSpec((TB, Dp), lambda i, nidx: (i, 0)),      # tails tile
            pl.BlockSpec((TB, Dp), lambda i, nidx: (i, 0)),      # rel tile
            pl.BlockSpec((2 * B, Dp), lambda i, nidx: (0, 0)),   # resident entity table
        ],
        out_specs=pl.BlockSpec((1, 8, 128), lambda i, nidx: (i, 0, 0)),
        scratch_shapes=[pltpu.VMEM((TB, N, Dp), jnp.float32),
                        pltpu.VMEM((TB, N, Dp), jnp.float32)],
    )

    partials = pl.pallas_call(
        _loss_kernel,
        out_shape=jax.ShapeDtypeStruct((num_tiles, 8, 128), jnp.float32),
        grid_spec=grid_spec,
        compiler_params=pltpu.CompilerParams(
            dimension_semantics=("parallel",),    # shard batch tiles across TCs (v7x)
            vmem_limit_bytes=64 * 1024 * 1024),
    )(nidx_flat, heads, tails, rel, ent_flat)

    hinge_total = jnp.sum(partials[:, 0, 0])
    sq_total = jnp.sum(partials[:, 0, 1])
    model_loss = hinge_total / (B * N)            # mean hinge over (B, N)
    reg_loss = sq_total / (3.0 * B * D)           # (mean h^2 + mean t^2 + mean r^2)/3
    return model_loss + REGULARIZER * reg_loss


def _reference_loss(ent_embs, rel_embs, neg_idx):
    """Pure-JAX reference: F.normalize + transe score + margin loss + l2 reg."""
    ent = _l2_normalize(ent_embs.astype(jnp.float32))     # (B, 2, D)
    rel = _l2_normalize(rel_embs.astype(jnp.float32))     # (B, 1, D)
    B, _, D = ent.shape
    heads, tails = ent[:, 0:1, :], ent[:, 1:2, :]
    pos = -jnp.sum(jnp.abs(heads + rel - tails), axis=-1)            # (B, 1)
    reg = (jnp.mean(heads ** 2) + jnp.mean(tails ** 2)
           + jnp.mean(rel ** 2)) / 3.0
    neg = ent.reshape(2 * B, D)[neg_idx]                             # (B, N, 2, D)
    nh, nt = neg[..., 0, :], neg[..., 1, :]
    negs = -jnp.sum(jnp.abs(nh + rel - nt), axis=-1)                 # (B, N)
    model_loss = jnp.mean(jnp.maximum(MARGIN - pos + negs, 0.0))
    return model_loss + REGULARIZER * reg


if __name__ == "__main__":
    key = jax.random.PRNGKey(0)
    B, D, N = 8, 32, 4          # batch, embedding dim, negatives per positive

    k1, k2, k3 = jax.random.split(key, 3)
    raw_ent = jax.random.normal(k1, (B, 2, D), dtype=jnp.float32)
    raw_rel = jax.random.normal(k2, (B, 1, D), dtype=jnp.float32)
    neg_idx = jax.random.randint(k3, (B, N, 2), minval=0, maxval=2 * B,
                                 dtype=jnp.int32)

    loss = jax.block_until_ready(link_prediction_loss(raw_ent, raw_rel, neg_idx))
    ref = jax.block_until_ready(_reference_loss(raw_ent, raw_rel, neg_idx))

    assert jnp.allclose(loss, ref, rtol=1e-5, atol=1e-5), (loss, ref)
    print("KERNEL_OK")
</pallas_src>

<mosaic_0001>
module attributes {stable_mosaic.version = 11 : i64} {
  func.func @_loss_kernel(%arg0: i32, %arg1: memref<64xi32, #tpu.memory_space<smem>>, %arg2: memref<8x128xf32, #tpu.memory_space<vmem>>, %arg3: memref<8x128xf32, #tpu.memory_space<vmem>>, %arg4: memref<8x128xf32, #tpu.memory_space<vmem>>, %arg5: memref<16x128xf32, #tpu.memory_space<vmem>>, %arg6: memref<1x8x128xf32, #tpu.memory_space<vmem>>, %arg7: memref<8x4x128xf32, #tpu.memory_space<vmem>>, %arg8: memref<8x4x128xf32, #tpu.memory_space<vmem>>) attributes {dimension_semantics = [#tpu.dimension_semantics<parallel>], iteration_bounds = array<i64: 1>, scalar_prefetch = 1 : i64, scratch_operands = 2 : i64, tpu.core_type = #tpu.core_type<tc>, window_params = [{transform_indices = @transform_0, window_bounds = array<i64: 8, 128>}, {transform_indices = @transform_1, window_bounds = array<i64: 8, 128>}, {transform_indices = @transform_2, window_bounds = array<i64: 8, 128>}, {pipeline_mode = #tpu.pipeline_mode<synchronous>, transform_indices = @transform_3, window_bounds = array<i64: 16, 128>}, {transform_indices = @transform_4, window_bounds = array<i64: 1, 8, 128>}]} {
    %c0 = arith.constant 0 : index
    %c0_0 = arith.constant 0 : index
    %0 = vector.load %arg2[%c0, %c0_0] : memref<8x128xf32, #tpu.memory_space<vmem>>, vector<8x128xf32>
    %1 = arith.mulf %0, %0 : vector<8x128xf32>
    %cst = arith.constant dense<0.000000e+00> : vector<8xf32>
    %2 = vector.multi_reduction <add>, %1, %cst [1] : vector<8x128xf32> to vector<8xf32>
    %3 = vector.shape_cast %2 : vector<8xf32> to vector<8x1xf32>
    %cst_1 = arith.constant 1.000000e-24 : f32
    %4 = vector.broadcast %cst_1 : f32 to vector<8x1xf32>
    %5 = arith.maximumf %3, %4 : vector<8x1xf32>
    %6 = math.rsqrt %5 : vector<8x1xf32>
    %7 = vector.broadcast %6 : vector<8x1xf32> to vector<8x128xf32>
    %8 = arith.mulf %0, %7 : vector<8x128xf32>
    %c0_2 = arith.constant 0 : index
    %c0_3 = arith.constant 0 : index
    %9 = vector.load %arg3[%c0_2, %c0_3] : memref<8x128xf32, #tpu.memory_space<vmem>>, vector<8x128xf32>
    %10 = arith.mulf %9, %9 : vector<8x128xf32>
    %cst_4 = arith.constant dense<0.000000e+00> : vector<8xf32>
    %11 = vector.multi_reduction <add>, %10, %cst_4 [1] : vector<8x128xf32> to vector<8xf32>
    %12 = vector.shape_cast %11 : vector<8xf32> to vector<8x1xf32>
    %cst_5 = arith.constant 1.000000e-24 : f32
    %13 = vector.broadcast %cst_5 : f32 to vector<8x1xf32>
    %14 = arith.maximumf %12, %13 : vector<8x1xf32>
    %15 = math.rsqrt %14 : vector<8x1xf32>
    %16 = vector.broadcast %15 : vector<8x1xf32> to vector<8x128xf32>
    %17 = arith.mulf %9, %16 : vector<8x128xf32>
    %c0_6 = arith.constant 0 : index
    %c0_7 = arith.constant 0 : index
    %18 = vector.load %arg4[%c0_6, %c0_7] : memref<8x128xf32, #tpu.memory_space<vmem>>, vector<8x128xf32>
    %19 = arith.mulf %18, %18 : vector<8x128xf32>
    %cst_8 = arith.constant dense<0.000000e+00> : vector<8xf32>
    %20 = vector.multi_reduction <add>, %19, %cst_8 [1] : vector<8x128xf32> to vector<8xf32>
    %21 = vector.shape_cast %20 : vector<8xf32> to vector<8x1xf32>
    %cst_9 = arith.constant 1.000000e-24 : f32
    %22 = vector.broadcast %cst_9 : f32 to vector<8x1xf32>
    %23 = arith.maximumf %21, %22 : vector<8x1xf32>
    %24 = math.rsqrt %23 : vector<8x1xf32>
    %25 = vector.broadcast %24 : vector<8x1xf32> to vector<8x128xf32>
    %26 = arith.mulf %18, %25 : vector<8x128xf32>
    %27 = arith.addf %8, %26 : vector<8x128xf32>
    %28 = arith.subf %27, %17 : vector<8x128xf32>
    %29 = math.absf %28 : vector<8x128xf32>
    %cst_10 = arith.constant dense<0.000000e+00> : vector<8xf32>
    %30 = vector.multi_reduction <add>, %29, %cst_10 [1] : vector<8x128xf32> to vector<8xf32>
    %31 = vector.shape_cast %30 : vector<8xf32> to vector<8x1xf32>
    %cst_11 = arith.constant 0.000000e+00 : f32
    %32 = vector.broadcast %cst_11 : f32 to vector<8x1xf32>
    %33 = arith.subf %32, %31 : vector<8x1xf32>
    %34 = arith.mulf %8, %8 : vector<8x128xf32>
    %35 = vector.shape_cast %34 : vector<8x128xf32> to vector<1x8x128xf32>
    %cst_12 = arith.constant dense<0.000000e+00> : vector<1xf32>
    %36 = vector.multi_reduction <add>, %35, %cst_12 [1, 2] : vector<1x8x128xf32> to vector<1xf32>
    %37 = vector.shape_cast %36 : vector<1xf32> to vector<1x1x1xf32>
    %38 = vector.extract %37[0, 0, 0] : f32 from vector<1x1x1xf32>
    %39 = arith.mulf %17, %17 : vector<8x128xf32>
    %40 = vector.shape_cast %39 : vector<8x128xf32> to vector<1x8x128xf32>
    %cst_13 = arith.constant dense<0.000000e+00> : vector<1xf32>
    %41 = vector.multi_reduction <add>, %40, %cst_13 [1, 2] : vector<1x8x128xf32> to vector<1xf32>
    %42 = vector.shape_cast %41 : vector<1xf32> to vector<1x1x1xf32>
    %43 = vector.extract %42[0, 0, 0] : f32 from vector<1x1x1xf32>
    %44 = arith.addf %38, %43 : f32
    %45 = arith.mulf %26, %26 : vector<8x128xf32>
    %46 = vector.shape_cast %45 : vector<8x128xf32> to vector<1x8x128xf32>
    %cst_14 = arith.constant dense<0.000000e+00> : vector<1xf32>
    %47 = vector.multi_reduction <add>, %46, %cst_14 [1, 2] : vector<1x8x128xf32> to vector<1xf32>
    %48 = vector.shape_cast %47 : vector<1xf32> to vector<1x1x1xf32>
    %49 = vector.extract %48[0, 0, 0] : f32 from vector<1x1x1xf32>
    %50 = arith.addf %44, %49 : f32
    %c64_i32 = arith.constant 64 : i32
    %51 = arith.muli %arg0, %c64_i32 : i32
    %c0_i32 = arith.constant 0 : i32
    %52 = arith.addi %51, %c0_i32 : i32
    %53 = arith.index_cast %52 : i32 to index
    %54 = memref.load %arg1[%53] : memref<64xi32, #tpu.memory_space<smem>>
    %c1_i32 = arith.constant 1 : i32
    %55 = arith.addi %52, %c1_i32 : i32
    %56 = arith.index_cast %55 : i32 to index
    %57 = memref.load %arg1[%56] : memref<64xi32, #tpu.memory_space<smem>>
    %58 = arith.index_cast %54 : i32 to index
    %c0_15 = arith.constant 0 : index
    %59 = vector.load %arg5[%58, %c0_15] : memref<16x128xf32, #tpu.memory_space<vmem>>, vector<1x128xf32>
    %60 = vector.shape_cast %59 : vector<1x128xf32> to vector<1x1x128xf32>
    %c0_16 = arith.constant 0 : index
    %c0_17 = arith.constant 0 : index
    %c0_18 = arith.constant 0 : index
    %61 = vector.load %arg7[%c0_16, %c0_17, %c0_18] : memref<8x4x128xf32, #tpu.memory_space<vmem>>, vector<1x1x128xf32>
    tpu.vector_store %arg7[%c0_16, %c0_17, %c0_18], %60 {strides = array<i32>} : memref<8x4x128xf32, #tpu.memory_space<vmem>>, vector<1x1x128xf32>,
    %62 = arith.index_cast %57 : i32 to index
    %c0_19 = arith.constant 0 : index
    %63 = vector.load %arg5[%62, %c0_19] : memref<16x128xf32, #tpu.memory_space<vmem>>, vector<1x128xf32>
    %64 = vector.shape_cast %63 : vector<1x128xf32> to vector<1x1x128xf32>
    %c0_20 = arith.constant 0 : index
    %c0_21 = arith.constant 0 : index
    %c0_22 = arith.constant 0 : index
    %65 = vector.load %arg8[%c0_20, %c0_21, %c0_22] : memref<8x4x128xf32, #tpu.memory_space<vmem>>, vector<1x1x128xf32>
    tpu.vector_store %arg8[%c0_20, %c0_21, %c0_22], %64 {strides = array<i32>} : memref<8x4x128xf32, #tpu.memory_space<vmem>>, vector<1x1x128xf32>,
    %c2_i32 = arith.constant 2 : i32
    %66 = arith.addi %51, %c2_i32 : i32
    %67 = arith.index_cast %66 : i32 to index
    %68 = memref.load %arg1[%67] : memref<64xi32, #tpu.memory_space<smem>>
    %c1_i32_23 = arith.constant 1 : i32
    %69 = arith.addi %66, %c1_i32_23 : i32
    %70 = arith.index_cast %69 : i32 to index
    %71 = memref.load %arg1[%70] : memref<64xi32, #tpu.memory_space<smem>>
    %72 = arith.index_cast %68 : i32 to index
    %c0_24 = arith.constant 0 : index
    %73 = vector.load %arg5[%72, %c0_24] : memref<16x128xf32, #tpu.memory_space<vmem>>, vector<1x128xf32>
    %74 = vector.shape_cast %73 : vector<1x128xf32> to vector<1x1x128xf32>
    %c0_25 = arith.constant 0 : index
    %c1 = arith.constant 1 : index
    %c0_26 = arith.constant 0 : index
    %75 = vector.load %arg7[%c0_25, %c1, %c0_26] : memref<8x4x128xf32, #tpu.memory_space<vmem>>, vector<1x1x128xf32>
    tpu.vector_store %arg7[%c0_25, %c1, %c0_26], %74 {strides = array<i32>} : memref<8x4x128xf32, #tpu.memory_space<vmem>>, vector<1x1x128xf32>,
    %76 = arith.index_cast %71 : i32 to index
    %c0_27 = arith.constant 0 : index
    %77 = vector.load %arg5[%76, %c0_27] : memref<16x128xf32, #tpu.memory_space<vmem>>, vector<1x128xf32>
    %78 = vector.shape_cast %77 : vector<1x128xf32> to vector<1x1x128xf32>
    %c0_28 = arith.constant 0 : index
    %c1_29 = arith.constant 1 : index
    %c0_30 = arith.constant 0 : index
    %79 = vector.load %arg8[%c0_28, %c1_29, %c0_30] : memref<8x4x128xf32, #tpu.memory_space<vmem>>, vector<1x1x128xf32>
    tpu.vector_store %arg8[%c0_28, %c1_29, %c0_30], %78 {strides = array<i32>} : memref<8x4x128xf32, #tpu.memory_space<vmem>>, vector<1x1x128xf32>,
    %c4_i32 = arith.constant 4 : i32
    %80 = arith.addi %51, %c4_i32 : i32
    %81 = arith.index_cast %80 : i32 to index
    %82 = memref.load %arg1[%81] : memref<64xi32, #tpu.memory_space<smem>>
    %c1_i32_31 = arith.constant 1 : i32
    %83 = arith.addi %80, %c1_i32_31 : i32
    %84 = arith.index_cast %83 : i32 to index
    %85 = memref.load %arg1[%84] : memref<64xi32, #tpu.memory_space<smem>>
    %86 = arith.index_cast %82 : i32 to index
    %c0_32 = arith.constant 0 : index
    %87 = vector.load %arg5[%86, %c0_32] : memref<16x128xf32, #tpu.memory_space<vmem>>, vector<1x128xf32>
    %88 = vector.shape_cast %87 : vector<1x128xf32> to vector<1x1x128xf32>
    %c0_33 = arith.constant 0 : index
    %c2 = arith.constant 2 : index
    %c0_34 = arith.constant 0 : index
    %89 = vector.load %arg7[%c0_33, %c2, %c0_34] : memref<8x4x128xf32, #tpu.memory_space<vmem>>, vector<1x1x128xf32>
    tpu.vector_store %arg7[%c0_33, %c2, %c0_34], %88 {strides = array<i32>} : memref<8x4x128xf32, #tpu.memory_space<vmem>>, vector<1x1x128xf32>,
    %90 = arith.index_cast %85 : i32 to index
    %c0_35 = arith.constant 0 : index
    %91 = vector.load %arg5[%90, %c0_35] : memref<16x128xf32, #tpu.memory_space<vmem>>, vector<1x128xf32>
    %92 = vector.shape_cast %91 : vector<1x128xf32> to vector<1x1x128xf32>
    %c0_36 = arith.constant 0 : index
    %c2_37 = arith.constant 2 : index
    %c0_38 = arith.constant 0 : index
    %93 = vector.load %arg8[%c0_36, %c2_37, %c0_38] : memref<8x4x128xf32, #tpu.memory_space<vmem>>, vector<1x1x128xf32>
    tpu.vector_store %arg8[%c0_36, %c2_37, %c0_38], %92 {strides = array<i32>} : memref<8x4x128xf32, #tpu.memory_space<vmem>>, vector<1x1x128xf32>,
    %c6_i32 = arith.constant 6 : i32
    %94 = arith.addi %51, %c6_i32 : i32
    %95 = arith.index_cast %94 : i32 to index
    %96 = memref.load %arg1[%95] : memref<64xi32, #tpu.memory_space<smem>>
    %c1_i32_39 = arith.constant 1 : i32
    %97 = arith.addi %94, %c1_i32_39 : i32
    %98 = arith.index_cast %97 : i32 to index
    %99 = memref.load %arg1[%98] : memref<64xi32, #tpu.memory_space<smem>>
    %100 = arith.index_cast %96 : i32 to index
    %c0_40 = arith.constant 0 : index
    %101 = vector.load %arg5[%100, %c0_40] : memref<16x128xf32, #tpu.memory_space<vmem>>, vector<1x128xf32>
    %102 = vector.shape_cast %101 : vector<1x128xf32> to vector<1x1x128xf32>
    %c0_41 = arith.constant 0 : index
    %c3 = arith.constant 3 : index
    %c0_42 = arith.constant 0 : index
    %103 = vector.load %arg7[%c0_41, %c3, %c0_42] : memref<8x4x128xf32, #tpu.memory_space<vmem>>, vector<1x1x128xf32>
    tpu.vector_store %arg7[%c0_41, %c3, %c0_42], %102 {strides = array<i32>} : memref<8x4x128xf32, #tpu.memory_space<vmem>>, vector<1x1x128xf32>,
    %104 = arith.index_cast %99 : i32 to index
    %c0_43 = arith.constant 0 : index
    %105 = vector.load %arg5[%104, %c0_43] : memref<16x128xf32, #tpu.memory_space<vmem>>, vector<1x128xf32>
    %106 = vector.shape_cast %105 : vector<1x128xf32> to vector<1x1x128xf32>
    %c0_44 = arith.constant 0 : index
    %c3_45 = arith.constant 3 : index
    %c0_46 = arith.constant 0 : index
    %107 = vector.load %arg8[%c0_44, %c3_45, %c0_46] : memref<8x4x128xf32, #tpu.memory_space<vmem>>, vector<1x1x128xf32>
    tpu.vector_store %arg8[%c0_44, %c3_45, %c0_46], %106 {strides = array<i32>} : memref<8x4x128xf32, #tpu.memory_space<vmem>>, vector<1x1x128xf32>,
    %c8_i32 = arith.constant 8 : i32
    %108 = arith.addi %51, %c8_i32 : i32
    %109 = arith.index_cast %108 : i32 to index
    %110 = memref.load %arg1[%109] : memref<64xi32, #tpu.memory_space<smem>>
    %c1_i32_47 = arith.constant 1 : i32
    %111 = arith.addi %108, %c1_i32_47 : i32
    %112 = arith.index_cast %111 : i32 to index
    %113 = memref.load %arg1[%112] : memref<64xi32, #tpu.memory_space<smem>>
    %114 = arith.index_cast %110 : i32 to index
    %c0_48 = arith.constant 0 : index
    %115 = vector.load %arg5[%114, %c0_48] : memref<16x128xf32, #tpu.memory_space<vmem>>, vector<1x128xf32>
    %116 = vector.shape_cast %115 : vector<1x128xf32> to vector<1x1x128xf32>
    %c1_49 = arith.constant 1 : index
    %c0_50 = arith.constant 0 : index
    %c0_51 = arith.constant 0 : index
    %117 = vector.load %arg7[%c1_49, %c0_50, %c0_51] : memref<8x4x128xf32, #tpu.memory_space<vmem>>, vector<1x1x128xf32>
    tpu.vector_store %arg7[%c1_49, %c0_50, %c0_51], %116 {strides = array<i32>} : memref<8x4x128xf32, #tpu.memory_space<vmem>>, vector<1x1x128xf32>,
    %118 = arith.index_cast %113 : i32 to index
    %c0_52 = arith.constant 0 : index
    %119 = vector.load %arg5[%118, %c0_52] : memref<16x128xf32, #tpu.memory_space<vmem>>, vector<1x128xf32>
    %120 = vector.shape_cast %119 : vector<1x128xf32> to vector<1x1x128xf32>
    %c1_53 = arith.constant 1 : index
    %c0_54 = arith.constant 0 : index
    %c0_55 = arith.constant 0 : index
    %121 = vector.load %arg8[%c1_53, %c0_54, %c0_55] : memref<8x4x128xf32, #tpu.memory_space<vmem>>, vector<1x1x128xf32>
    tpu.vector_store %arg8[%c1_53, %c0_54, %c0_55], %120 {strides = array<i32>} : memref<8x4x128xf32, #tpu.memory_space<vmem>>, vector<1x1x128xf32>,
    %c10_i32 = arith.constant 10 : i32
    %122 = arith.addi %51, %c10_i32 : i32
    %123 = arith.index_cast %122 : i32 to index
    %124 = memref.load %arg1[%123] : memref<64xi32, #tpu.memory_space<smem>>
    %c1_i32_56 = arith.constant 1 : i32
    %125 = arith.addi %122, %c1_i32_56 : i32
    %126 = arith.index_cast %125 : i32 to index
    %127 = memref.load %arg1[%126] : memref<64xi32, #tpu.memory_space<smem>>
    %128 = arith.index_cast %124 : i32 to index
    %c0_57 = arith.constant 0 : index
    %129 = vector.load %arg5[%128, %c0_57] : memref<16x128xf32, #tpu.memory_space<vmem>>, vector<1x128xf32>
    %130 = vector.shape_cast %129 : vector<1x128xf32> to vector<1x1x128xf32>
    %c1_58 = arith.constant 1 : index
    %c1_59 = arith.constant 1 : index
    %c0_60 = arith.constant 0 : index
    %131 = vector.load %arg7[%c1_58, %c1_59, %c0_60] : memref<8x4x128xf32, #tpu.memory_space<vmem>>, vector<1x1x128xf32>
    tpu.vector_store %arg7[%c1_58, %c1_59, %c0_60], %130 {strides = array<i32>} : memref<8x4x128xf32, #tpu.memory_space<vmem>>, vector<1x1x128xf32>,
    %132 = arith.index_cast %127 : i32 to index
    %c0_61 = arith.constant 0 : index
    %133 = vector.load %arg5[%132, %c0_61] : memref<16x128xf32, #tpu.memory_space<vmem>>, vector<1x128xf32>
    %134 = vector.shape_cast %133 : vector<1x128xf32> to vector<1x1x128xf32>
    %c1_62 = arith.constant 1 : index
    %c1_63 = arith.constant 1 : index
    %c0_64 = arith.constant 0 : index
    %135 = vector.load %arg8[%c1_62, %c1_63, %c0_64] : memref<8x4x128xf32, #tpu.memory_space<vmem>>, vector<1x1x128xf32>
    tpu.vector_store %arg8[%c1_62, %c1_63, %c0_64], %134 {strides = array<i32>} : memref<8x4x128xf32, #tpu.memory_space<vmem>>, vector<1x1x128xf32>,
    %c12_i32 = arith.constant 12 : i32
    %136 = arith.addi %51, %c12_i32 : i32
    %137 = arith.index_cast %136 : i32 to index
    %138 = memref.load %arg1[%137] : memref<64xi32, #tpu.memory_space<smem>>
    %c1_i32_65 = arith.constant 1 : i32
    %139 = arith.addi %136, %c1_i32_65 : i32
    %140 = arith.index_cast %139 : i32 to index
    %141 = memref.load %arg1[%140] : memref<64xi32, #tpu.memory_space<smem>>
    %142 = arith.index_cast %138 : i32 to index
    %c0_66 = arith.constant 0 : index
    %143 = vector.load %arg5[%142, %c0_66] : memref<16x128xf32, #tpu.memory_space<vmem>>, vector<1x128xf32>
    %144 = vector.shape_cast %143 : vector<1x128xf32> to vector<1x1x128xf32>
    %c1_67 = arith.constant 1 : index
    %c2_68 = arith.constant 2 : index
    %c0_69 = arith.constant 0 : index
    %145 = vector.load %arg7[%c1_67, %c2_68, %c0_69] : memref<8x4x128xf32, #tpu.memory_space<vmem>>, vector<1x1x128xf32>
    tpu.vector_store %arg7[%c1_67, %c2_68, %c0_69], %144 {strides = array<i32>} : memref<8x4x128xf32, #tpu.memory_space<vmem>>, vector<1x1x128xf32>,
    %146 = arith.index_cast %141 : i32 to index
    %c0_70 = arith.constant 0 : index
    %147 = vector.load %arg5[%146, %c0_70] : memref<16x128xf32, #tpu.memory_space<vmem>>, vector<1x128xf32>
    %148 = vector.shape_cast %147 : vector<1x128xf32> to vector<1x1x128xf32>
    %c1_71 = arith.constant 1 : index
    %c2_72 = arith.constant 2 : index
    %c0_73 = arith.constant 0 : index
    %149 = vector.load %arg8[%c1_71, %c2_72, %c0_73] : memref<8x4x128xf32, #tpu.memory_space<vmem>>, vector<1x1x128xf32>
    tpu.vector_store %arg8[%c1_71, %c2_72, %c0_73], %148 {strides = array<i32>} : memref<8x4x128xf32, #tpu.memory_space<vmem>>, vector<1x1x128xf32>,
    %c14_i32 = arith.constant 14 : i32
    %150 = arith.addi %51, %c14_i32 : i32
    %151 = arith.index_cast %150 : i32 to index
    %152 = memref.load %arg1[%151] : memref<64xi32, #tpu.memory_space<smem>>
    %c1_i32_74 = arith.constant 1 : i32
    %153 = arith.addi %150, %c1_i32_74 : i32
    %154 = arith.index_cast %153 : i32 to index
    %155 = memref.load %arg1[%154] : memref<64xi32, #tpu.memory_space<smem>>
    %156 = arith.index_cast %152 : i32 to index
    %c0_75 = arith.constant 0 : index
    %157 = vector.load %arg5[%156, %c0_75] : memref<16x128xf32, #tpu.memory_space<vmem>>, vector<1x128xf32>
    %158 = vector.shape_cast %157 : vector<1x128xf32> to vector<1x1x128xf32>
    %c1_76 = arith.constant 1 : index
    %c3_77 = arith.constant 3 : index
    %c0_78 = arith.constant 0 : index
    %159 = vector.load %arg7[%c1_76, %c3_77, %c0_78] : memref<8x4x128xf32, #tpu.memory_space<vmem>>, vector<1x1x128xf32>
    tpu.vector_store %arg7[%c1_76, %c3_77, %c0_78], %158 {strides = array<i32>} : memref<8x4x128xf32, #tpu.memory_space<vmem>>, vector<1x1x128xf32>,
    %160 = arith.index_cast %155 : i32 to index
    %c0_79 = arith.constant 0 : index
    %161 = vector.load %arg5[%160, %c0_79] : memref<16x128xf32, #tpu.memory_space<vmem>>, vector<1x128xf32>
    %162 = vector.shape_cast %161 : vector<1x128xf32> to vector<1x1x128xf32>
    %c1_80 = arith.constant 1 : index
    %c3_81 = arith.constant 3 : index
    %c0_82 = arith.constant 0 : index
    %163 = vector.load %arg8[%c1_80, %c3_81, %c0_82] : memref<8x4x128xf32, #tpu.memory_space<vmem>>, vector<1x1x128xf32>
    tpu.vector_store %arg8[%c1_80, %c3_81, %c0_82], %162 {strides = array<i32>} : memref<8x4x128xf32, #tpu.memory_space<vmem>>, vector<1x1x128xf32>,
    %c16_i32 = arith.constant 16 : i32
    %164 = arith.addi %51, %c16_i32 : i32
    %165 = arith.index_cast %164 : i32 to index
    %166 = memref.load %arg1[%165] : memref<64xi32, #tpu.memory_space<smem>>
    %c1_i32_83 = arith.constant 1 : i32
    %167 = arith.addi %164, %c1_i32_83 : i32
    %168 = arith.index_cast %167 : i32 to index
    %169 = memref.load %arg1[%168] : memref<64xi32, #tpu.memory_space<smem>>
    %170 = arith.index_cast %166 : i32 to index
    %c0_84 = arith.constant 0 : index
    %171 = vector.load %arg5[%170, %c0_84] : memref<16x128xf32, #tpu.memory_space<vmem>>, vector<1x128xf32>
    %172 = vector.shape_cast %171 : vector<1x128xf32> to vector<1x1x128xf32>
    %c2_85 = arith.constant 2 : index
    %c0_86 = arith.constant 0 : index
    %c0_87 = arith.constant 0 : index
    %173 = vector.load %arg7[%c2_85, %c0_86, %c0_87] : memref<8x4x128xf32, #tpu.memory_space<vmem>>, vector<1x1x128xf32>
    tpu.vector_store %arg7[%c2_85, %c0_86, %c0_87], %172 {strides = array<i32>} : memref<8x4x128xf32, #tpu.memory_space<vmem>>, vector<1x1x128xf32>,
    %174 = arith.index_cast %169 : i32 to index
    %c0_88 = arith.constant 0 : index
    %175 = vector.load %arg5[%174, %c0_88] : memref<16x128xf32, #tpu.memory_space<vmem>>, vector<1x128xf32>
    %176 = vector.shape_cast %175 : vector<1x128xf32> to vector<1x1x128xf32>
    %c2_89 = arith.constant 2 : index
    %c0_90 = arith.constant 0 : index
    %c0_91 = arith.constant 0 : index
    %177 = vector.load %arg8[%c2_89, %c0_90, %c0_91] : memref<8x4x128xf32, #tpu.memory_space<vmem>>, vector<1x1x128xf32>
    tpu.vector_store %arg8[%c2_89, %c0_90, %c0_91], %176 {strides = array<i32>} : memref<8x4x128xf32, #tpu.memory_space<vmem>>, vector<1x1x128xf32>,
    %c18_i32 = arith.constant 18 : i32
    %178 = arith.addi %51, %c18_i32 : i32
    %179 = arith.index_cast %178 : i32 to index
    %180 = memref.load %arg1[%179] : memref<64xi32, #tpu.memory_space<smem>>
    %c1_i32_92 = arith.constant 1 : i32
    %181 = arith.addi %178, %c1_i32_92 : i32
    %182 = arith.index_cast %181 : i32 to index
    %183 = memref.load %arg1[%182] : memref<64xi32, #tpu.memory_space<smem>>
    %184 = arith.index_cast %180 : i32 to index
    %c0_93 = arith.constant 0 : index
    %185 = vector.load %arg5[%184, %c0_93] : memref<16x128xf32, #tpu.memory_space<vmem>>, vector<1x128xf32>
    %186 = vector.shape_cast %185 : vector<1x128xf32> to vector<1x1x128xf32>
    %c2_94 = arith.constant 2 : index
    %c1_95 = arith.constant 1 : index
    %c0_96 = arith.constant 0 : index
    %187 = vector.load %arg7[%c2_94, %c1_95, %c0_96] : memref<8x4x128xf32, #tpu.memory_space<vmem>>, vector<1x1x128xf32>
    tpu.vector_store %arg7[%c2_94, %c1_95, %c0_96], %186 {strides = array<i32>} : memref<8x4x128xf32, #tpu.memory_space<vmem>>, vector<1x1x128xf32>,
    %188 = arith.index_cast %183 : i32 to index
    %c0_97 = arith.constant 0 : index
    %189 = vector.load %arg5[%188, %c0_97] : memref<16x128xf32, #tpu.memory_space<vmem>>, vector<1x128xf32>
    %190 = vector.shape_cast %189 : vector<1x128xf32> to vector<1x1x128xf32>
    %c2_98 = arith.constant 2 : index
    %c1_99 = arith.constant 1 : index
    %c0_100 = arith.constant 0 : index
    %191 = vector.load %arg8[%c2_98, %c1_99, %c0_100] : memref<8x4x128xf32, #tpu.memory_space<vmem>>, vector<1x1x128xf32>
    tpu.vector_store %arg8[%c2_98, %c1_99, %c0_100], %190 {strides = array<i32>} : memref<8x4x128xf32, #tpu.memory_space<vmem>>, vector<1x1x128xf32>,
    %c20_i32 = arith.constant 20 : i32
    %192 = arith.addi %51, %c20_i32 : i32
    %193 = arith.index_cast %192 : i32 to index
    %194 = memref.load %arg1[%193] : memref<64xi32, #tpu.memory_space<smem>>
    %c1_i32_101 = arith.constant 1 : i32
    %195 = arith.addi %192, %c1_i32_101 : i32
    %196 = arith.index_cast %195 : i32 to index
    %197 = memref.load %arg1[%196] : memref<64xi32, #tpu.memory_space<smem>>
    %198 = arith.index_cast %194 : i32 to index
    %c0_102 = arith.constant 0 : index
    %199 = vector.load %arg5[%198, %c0_102] : memref<16x128xf32, #tpu.memory_space<vmem>>, vector<1x128xf32>
    %200 = vector.shape_cast %199 : vector<1x128xf32> to vector<1x1x128xf32>
    %c2_103 = arith.constant 2 : index
    %c2_104 = arith.constant 2 : index
    %c0_105 = arith.constant 0 : index
    %201 = vector.load %arg7[%c2_103, %c2_104, %c0_105] : memref<8x4x128xf32, #tpu.memory_space<vmem>>, vector<1x1x128xf32>
    tpu.vector_store %arg7[%c2_103, %c2_104, %c0_105], %200 {strides = array<i32>} : memref<8x4x128xf32, #tpu.memory_space<vmem>>, vector<1x1x128xf32>,
    %202 = arith.index_cast %197 : i32 to index
    %c0_106 = arith.constant 0 : index
    %203 = vector.load %arg5[%202, %c0_106] : memref<16x128xf32, #tpu.memory_space<vmem>>, vector<1x128xf32>
    %204 = vector.shape_cast %203 : vector<1x128xf32> to vector<1x1x128xf32>
    %c2_107 = arith.constant 2 : index
    %c2_108 = arith.constant 2 : index
    %c0_109 = arith.constant 0 : index
    %205 = vector.load %arg8[%c2_107, %c2_108, %c0_109] : memref<8x4x128xf32, #tpu.memory_space<vmem>>, vector<1x1x128xf32>
    tpu.vector_store %arg8[%c2_107, %c2_108, %c0_109], %204 {strides = array<i32>} : memref<8x4x128xf32, #tpu.memory_space<vmem>>, vector<1x1x128xf32>,
    %c22_i32 = arith.constant 22 : i32
    %206 = arith.addi %51, %c22_i32 : i32
    %207 = arith.index_cast %206 : i32 to index
    %208 = memref.load %arg1[%207] : memref<64xi32, #tpu.memory_space<smem>>
    %c1_i32_110 = arith.constant 1 : i32
    %209 = arith.addi %206, %c1_i32_110 : i32
    %210 = arith.index_cast %209 : i32 to index
    %211 = memref.load %arg1[%210] : memref<64xi32, #tpu.memory_space<smem>>
    %212 = arith.index_cast %208 : i32 to index
    %c0_111 = arith.constant 0 : index
    %213 = vector.load %arg5[%212, %c0_111] : memref<16x128xf32, #tpu.memory_space<vmem>>, vector<1x128xf32>
    %214 = vector.shape_cast %213 : vector<1x128xf32> to vector<1x1x128xf32>
    %c2_112 = arith.constant 2 : index
    %c3_113 = arith.constant 3 : index
    %c0_114 = arith.constant 0 : index
    %215 = vector.load %arg7[%c2_112, %c3_113, %c0_114] : memref<8x4x128xf32, #tpu.memory_space<vmem>>, vector<1x1x128xf32>
    tpu.vector_store %arg7[%c2_112, %c3_113, %c0_114], %214 {strides = array<i32>} : memref<8x4x128xf32, #tpu.memory_space<vmem>>, vector<1x1x128xf32>,
    %216 = arith.index_cast %211 : i32 to index
    %c0_115 = arith.constant 0 : index
    %217 = vector.load %arg5[%216, %c0_115] : memref<16x128xf32, #tpu.memory_space<vmem>>, vector<1x128xf32>
    %218 = vector.shape_cast %217 : vector<1x128xf32> to vector<1x1x128xf32>
    %c2_116 = arith.constant 2 : index
    %c3_117 = arith.constant 3 : index
    %c0_118 = arith.constant 0 : index
    %219 = vector.load %arg8[%c2_116, %c3_117, %c0_118] : memref<8x4x128xf32, #tpu.memory_space<vmem>>, vector<1x1x128xf32>
    tpu.vector_store %arg8[%c2_116, %c3_117, %c0_118], %218 {strides = array<i32>} : memref<8x4x128xf32, #tpu.memory_space<vmem>>, vector<1x1x128xf32>,
    %c24_i32 = arith.constant 24 : i32
    %220 = arith.addi %51, %c24_i32 : i32
    %221 = arith.index_cast %220 : i32 to index
    %222 = memref.load %arg1[%221] : memref<64xi32, #tpu.memory_space<smem>>
    %c1_i32_119 = arith.constant 1 : i32
    %223 = arith.addi %220, %c1_i32_119 : i32
    %224 = arith.index_cast %223 : i32 to index
    %225 = memref.load %arg1[%224] : memref<64xi32, #tpu.memory_space<smem>>
    %226 = arith.index_cast %222 : i32 to index
    %c0_120 = arith.constant 0 : index
    %227 = vector.load %arg5[%226, %c0_120] : memref<16x128xf32, #tpu.memory_space<vmem>>, vector<1x128xf32>
    %228 = vector.shape_cast %227 : vector<1x128xf32> to vector<1x1x128xf32>
    %c3_121 = arith.constant 3 : index
    %c0_122 = arith.constant 0 : index
    %c0_123 = arith.constant 0 : index
    %229 = vector.load %arg7[%c3_121, %c0_122, %c0_123] : memref<8x4x128xf32, #tpu.memory_space<vmem>>, vector<1x1x128xf32>
    tpu.vector_store %arg7[%c3_121, %c0_122, %c0_123], %228 {strides = array<i32>} : memref<8x4x128xf32, #tpu.memory_space<vmem>>, vector<1x1x128xf32>,
    %230 = arith.index_cast %225 : i32 to index
    %c0_124 = arith.constant 0 : index
    %231 = vector.load %arg5[%230, %c0_124] : memref<16x128xf32, #tpu.memory_space<vmem>>, vector<1x128xf32>
    %232 = vector.shape_cast %231 : vector<1x128xf32> to vector<1x1x128xf32>
    %c3_125 = arith.constant 3 : index
    %c0_126 = arith.constant 0 : index
    %c0_127 = arith.constant 0 : index
    %233 = vector.load %arg8[%c3_125, %c0_126, %c0_127] : memref<8x4x128xf32, #tpu.memory_space<vmem>>, vector<1x1x128xf32>
    tpu.vector_store %arg8[%c3_125, %c0_126, %c0_127], %232 {strides = array<i32>} : memref<8x4x128xf32, #tpu.memory_space<vmem>>, vector<1x1x128xf32>,
    %c26_i32 = arith.constant 26 : i32
    %234 = arith.addi %51, %c26_i32 : i32
    %235 = arith.index_cast %234 : i32 to index
    %236 = memref.load %arg1[%235] : memref<64xi32, #tpu.memory_space<smem>>
    %c1_i32_128 = arith.constant 1 : i32
    %237 = arith.addi %234, %c1_i32_128 : i32
    %238 = arith.index_cast %237 : i32 to index
    %239 = memref.load %arg1[%238] : memref<64xi32, #tpu.memory_space<smem>>
    %240 = arith.index_cast %236 : i32 to index
    %c0_129 = arith.constant 0 : index
    %241 = vector.load %arg5[%240, %c0_129] : memref<16x128xf32, #tpu.memory_space<vmem>>, vector<1x128xf32>
    %242 = vector.shape_cast %241 : vector<1x128xf32> to vector<1x1x128xf32>
    %c3_130 = arith.constant 3 : index
    %c1_131 = arith.constant 1 : index
    %c0_132 = arith.constant 0 : index
    %243 = vector.load %arg7[%c3_130, %c1_131, %c0_132] : memref<8x4x128xf32, #tpu.memory_space<vmem>>, vector<1x1x128xf32>
    tpu.vector_store %arg7[%c3_130, %c1_131, %c0_132], %242 {strides = array<i32>} : memref<8x4x128xf32, #tpu.memory_space<vmem>>, vector<1x1x128xf32>,
    %244 = arith.index_cast %239 : i32 to index
    %c0_133 = arith.constant 0 : index
    %245 = vector.load %arg5[%244, %c0_133] : memref<16x128xf32, #tpu.memory_space<vmem>>, vector<1x128xf32>
    %246 = vector.shape_cast %245 : vector<1x128xf32> to vector<1x1x128xf32>
    %c3_134 = arith.constant 3 : index
    %c1_135 = arith.constant 1 : index
    %c0_136 = arith.constant 0 : index
    %247 = vector.load %arg8[%c3_134, %c1_135, %c0_136] : memref<8x4x128xf32, #tpu.memory_space<vmem>>, vector<1x1x128xf32>
    tpu.vector_store %arg8[%c3_134, %c1_135, %c0_136], %246 {strides = array<i32>} : memref<8x4x128xf32, #tpu.memory_space<vmem>>, vector<1x1x128xf32>,
    %c28_i32 = arith.constant 28 : i32
    %248 = arith.addi %51, %c28_i32 : i32
    %249 = arith.index_cast %248 : i32 to index
    %250 = memref.load %arg1[%249] : memref<64xi32, #tpu.memory_space<smem>>
    %c1_i32_137 = arith.constant 1 : i32
    %251 = arith.addi %248, %c1_i32_137 : i32
    %252 = arith.index_cast %251 : i32 to index
    %253 = memref.load %arg1[%252] : memref<64xi32, #tpu.memory_space<smem>>
    %254 = arith.index_cast %250 : i32 to index
    %c0_138 = arith.constant 0 : index
    %255 = vector.load %arg5[%254, %c0_138] : memref<16x128xf32, #tpu.memory_space<vmem>>, vector<1x128xf32>
    %256 = vector.shape_cast %255 : vector<1x128xf32> to vector<1x1x128xf32>
    %c3_139 = arith.constant 3 : index
    %c2_140 = arith.constant 2 : index
    %c0_141 = arith.constant 0 : index
    %257 = vector.load %arg7[%c3_139, %c2_140, %c0_141] : memref<8x4x128xf32, #tpu.memory_space<vmem>>, vector<1x1x128xf32>
    tpu.vector_store %arg7[%c3_139, %c2_140, %c0_141], %256 {strides = array<i32>} : memref<8x4x128xf32, #tpu.memory_space<vmem>>, vector<1x1x128xf32>,
    %258 = arith.index_cast %253 : i32 to index
    %c0_142 = arith.constant 0 : index
    %259 = vector.load %arg5[%258, %c0_142] : memref<16x128xf32, #tpu.memory_space<vmem>>, vector<1x128xf32>
    %260 = vector.shape_cast %259 : vector<1x128xf32> to vector<1x1x128xf32>
    %c3_143 = arith.constant 3 : index
    %c2_144 = arith.constant 2 : index
    %c0_145 = arith.constant 0 : index
    %261 = vector.load %arg8[%c3_143, %c2_144, %c0_145] : memref<8x4x128xf32, #tpu.memory_space<vmem>>, vector<1x1x128xf32>
    tpu.vector_store %arg8[%c3_143, %c2_144, %c0_145], %260 {strides = array<i32>} : memref<8x4x128xf32, #tpu.memory_space<vmem>>, vector<1x1x128xf32>,
    %c30_i32 = arith.constant 30 : i32
    %262 = arith.addi %51, %c30_i32 : i32
    %263 = arith.index_cast %262 : i32 to index
    %264 = memref.load %arg1[%263] : memref<64xi32, #tpu.memory_space<smem>>
    %c1_i32_146 = arith.constant 1 : i32
    %265 = arith.addi %262, %c1_i32_146 : i32
    %266 = arith.index_cast %265 : i32 to index
    %267 = memref.load %arg1[%266] : memref<64xi32, #tpu.memory_space<smem>>
    %268 = arith.index_cast %264 : i32 to index
    %c0_147 = arith.constant 0 : index
    %269 = vector.load %arg5[%268, %c0_147] : memref<16x128xf32, #tpu.memory_space<vmem>>, vector<1x128xf32>
    %270 = vector.shape_cast %269 : vector<1x128xf32> to vector<1x1x128xf32>
    %c3_148 = arith.constant 3 : index
    %c3_149 = arith.constant 3 : index
    %c0_150 = arith.constant 0 : index
    %271 = vector.load %arg7[%c3_148, %c3_149, %c0_150] : memref<8x4x128xf32, #tpu.memory_space<vmem>>, vector<1x1x128xf32>
    tpu.vector_store %arg7[%c3_148, %c3_149, %c0_150], %270 {strides = array<i32>} : memref<8x4x128xf32, #tpu.memory_space<vmem>>, vector<1x1x128xf32>,
    %272 = arith.index_cast %267 : i32 to index
    %c0_151 = arith.constant 0 : index
    %273 = vector.load %arg5[%272, %c0_151] : memref<16x128xf32, #tpu.memory_space<vmem>>, vector<1x128xf32>
    %274 = vector.shape_cast %273 : vector<1x128xf32> to vector<1x1x128xf32>
    %c3_152 = arith.constant 3 : index
    %c3_153 = arith.constant 3 : index
    %c0_154 = arith.constant 0 : index
    %275 = vector.load %arg8[%c3_152, %c3_153, %c0_154] : memref<8x4x128xf32, #tpu.memory_space<vmem>>, vector<1x1x128xf32>
    tpu.vector_store %arg8[%c3_152, %c3_153, %c0_154], %274 {strides = array<i32>} : memref<8x4x128xf32, #tpu.memory_space<vmem>>, vector<1x1x128xf32>,
    %c32_i32 = arith.constant 32 : i32
    %276 = arith.addi %51, %c32_i32 : i32
    %277 = arith.index_cast %276 : i32 to index
    %278 = memref.load %arg1[%277] : memref<64xi32, #tpu.memory_space<smem>>
    %c1_i32_155 = arith.constant 1 : i32
    %279 = arith.addi %276, %c1_i32_155 : i32
    %280 = arith.index_cast %279 : i32 to index
    %281 = memref.load %arg1[%280] : memref<64xi32, #tpu.memory_space<smem>>
    %282 = arith.index_cast %278 : i32 to index
    %c0_156 = arith.constant 0 : index
    %283 = vector.load %arg5[%282, %c0_156] : memref<16x128xf32, #tpu.memory_space<vmem>>, vector<1x128xf32>
    %284 = vector.shape_cast %283 : vector<1x128xf32> to vector<1x1x128xf32>
    %c4 = arith.constant 4 : index
    %c0_157 = arith.constant 0 : index
    %c0_158 = arith.constant 0 : index
    %285 = vector.load %arg7[%c4, %c0_157, %c0_158] : memref<8x4x128xf32, #tpu.memory_space<vmem>>, vector<1x1x128xf32>
    tpu.vector_store %arg7[%c4, %c0_157, %c0_158], %284 {strides = array<i32>} : memref<8x4x128xf32, #tpu.memory_space<vmem>>, vector<1x1x128xf32>,
    %286 = arith.index_cast %281 : i32 to index
    %c0_159 = arith.constant 0 : index
    %287 = vector.load %arg5[%286, %c0_159] : memref<16x128xf32, #tpu.memory_space<vmem>>, vector<1x128xf32>
    %288 = vector.shape_cast %287 : vector<1x128xf32> to vector<1x1x128xf32>
    %c4_160 = arith.constant 4 : index
    %c0_161 = arith.constant 0 : index
    %c0_162 = arith.constant 0 : index
    %289 = vector.load %arg8[%c4_160, %c0_161, %c0_162] : memref<8x4x128xf32, #tpu.memory_space<vmem>>, vector<1x1x128xf32>
    tpu.vector_store %arg8[%c4_160, %c0_161, %c0_162], %288 {strides = array<i32>} : memref<8x4x128xf32, #tpu.memory_space<vmem>>, vector<1x1x128xf32>,
    %c34_i32 = arith.constant 34 : i32
    %290 = arith.addi %51, %c34_i32 : i32
    %291 = arith.index_cast %290 : i32 to index
    %292 = memref.load %arg1[%291] : memref<64xi32, #tpu.memory_space<smem>>
    %c1_i32_163 = arith.constant 1 : i32
    %293 = arith.addi %290, %c1_i32_163 : i32
    %294 = arith.index_cast %293 : i32 to index
    %295 = memref.load %arg1[%294] : memref<64xi32, #tpu.memory_space<smem>>
    %296 = arith.index_cast %292 : i32 to index
    %c0_164 = arith.constant 0 : index
    %297 = vector.load %arg5[%296, %c0_164] : memref<16x128xf32, #tpu.memory_space<vmem>>, vector<1x128xf32>
    %298 = vector.shape_cast %297 : vector<1x128xf32> to vector<1x1x128xf32>
    %c4_165 = arith.constant 4 : index
    %c1_166 = arith.constant 1 : index
    %c0_167 = arith.constant 0 : index
    %299 = vector.load %arg7[%c4_165, %c1_166, %c0_167] : memref<8x4x128xf32, #tpu.memory_space<vmem>>, vector<1x1x128xf32>
    tpu.vector_store %arg7[%c4_165, %c1_166, %c0_167], %298 {strides = array<i32>} : memref<8x4x128xf32, #tpu.memory_space<vmem>>, vector<1x1x128xf32>,
    %300 = arith.index_cast %295 : i32 to index
    %c0_168 = arith.constant 0 : index
    %301 = vector.load %arg5[%300, %c0_168] : memref<16x128xf32, #tpu.memory_space<vmem>>, vector<1x128xf32>
    %302 = vector.shape_cast %301 : vector<1x128xf32> to vector<1x1x128xf32>
    %c4_169 = arith.constant 4 : index
    %c1_170 = arith.constant 1 : index
    %c0_171 = arith.constant 0 : index
    %303 = vector.load %arg8[%c4_169, %c1_170, %c0_171] : memref<8x4x128xf32, #tpu.memory_space<vmem>>, vector<1x1x128xf32>
    tpu.vector_store %arg8[%c4_169, %c1_170, %c0_171], %302 {strides = array<i32>} : memref<8x4x128xf32, #tpu.memory_space<vmem>>, vector<1x1x128xf32>,
    %c36_i32 = arith.constant 36 : i32
    %304 = arith.addi %51, %c36_i32 : i32
    %305 = arith.index_cast %304 : i32 to index
    %306 = memref.load %arg1[%305] : memref<64xi32, #tpu.memory_space<smem>>
    %c1_i32_172 = arith.constant 1 : i32
    %307 = arith.addi %304, %c1_i32_172 : i32
    %308 = arith.index_cast %307 : i32 to index
    %309 = memref.load %arg1[%308] : memref<64xi32, #tpu.memory_space<smem>>
    %310 = arith.index_cast %306 : i32 to index
    %c0_173 = arith.constant 0 : index
    %311 = vector.load %arg5[%310, %c0_173] : memref<16x128xf32, #tpu.memory_space<vmem>>, vector<1x128xf32>
    %312 = vector.shape_cast %311 : vector<1x128xf32> to vector<1x1x128xf32>
    %c4_174 = arith.constant 4 : index
    %c2_175 = arith.constant 2 : index
    %c0_176 = arith.constant 0 : index
    %313 = vector.load %arg7[%c4_174, %c2_175, %c0_176] : memref<8x4x128xf32, #tpu.memory_space<vmem>>, vector<1x1x128xf32>
    tpu.vector_store %arg7[%c4_174, %c2_175, %c0_176], %312 {strides = array<i32>} : memref<8x4x128xf32, #tpu.memory_space<vmem>>, vector<1x1x128xf32>,
    %314 = arith.index_cast %309 : i32 to index
    %c0_177 = arith.constant 0 : index
    %315 = vector.load %arg5[%314, %c0_177] : memref<16x128xf32, #tpu.memory_space<vmem>>, vector<1x128xf32>
    %316 = vector.shape_cast %315 : vector<1x128xf32> to vector<1x1x128xf32>
    %c4_178 = arith.constant 4 : index
    %c2_179 = arith.constant 2 : index
    %c0_180 = arith.constant 0 : index
    %317 = vector.load %arg8[%c4_178, %c2_179, %c0_180] : memref<8x4x128xf32, #tpu.memory_space<vmem>>, vector<1x1x128xf32>
    tpu.vector_store %arg8[%c4_178, %c2_179, %c0_180], %316 {strides = array<i32>} : memref<8x4x128xf32, #tpu.memory_space<vmem>>, vector<1x1x128xf32>,
    %c38_i32 = arith.constant 38 : i32
    %318 = arith.addi %51, %c38_i32 : i32
    %319 = arith.index_cast %318 : i32 to index
    %320 = memref.load %arg1[%319] : memref<64xi32, #tpu.memory_space<smem>>
    %c1_i32_181 = arith.constant 1 : i32
    %321 = arith.addi %318, %c1_i32_181 : i32
    %322 = arith.index_cast %321 : i32 to index
    %323 = memref.load %arg1[%322] : memref<64xi32, #tpu.memory_space<smem>>
    %324 = arith.index_cast %320 : i32 to index
    %c0_182 = arith.constant 0 : index
    %325 = vector.load %arg5[%324, %c0_182] : memref<16x128xf32, #tpu.memory_space<vmem>>, vector<1x128xf32>
    %326 = vector.shape_cast %325 : vector<1x128xf32> to vector<1x1x128xf32>
    %c4_183 = arith.constant 4 : index
    %c3_184 = arith.constant 3 : index
    %c0_185 = arith.constant 0 : index
    %327 = vector.load %arg7[%c4_183, %c3_184, %c0_185] : memref<8x4x128xf32, #tpu.memory_space<vmem>>, vector<1x1x128xf32>
    tpu.vector_store %arg7[%c4_183, %c3_184, %c0_185], %326 {strides = array<i32>} : memref<8x4x128xf32, #tpu.memory_space<vmem>>, vector<1x1x128xf32>,
    %328 = arith.index_cast %323 : i32 to index
    %c0_186 = arith.constant 0 : index
    %329 = vector.load %arg5[%328, %c0_186] : memref<16x128xf32, #tpu.memory_space<vmem>>, vector<1x128xf32>
    %330 = vector.shape_cast %329 : vector<1x128xf32> to vector<1x1x128xf32>
    %c4_187 = arith.constant 4 : index
    %c3_188 = arith.constant 3 : index
    %c0_189 = arith.constant 0 : index
    %331 = vector.load %arg8[%c4_187, %c3_188, %c0_189] : memref<8x4x128xf32, #tpu.memory_space<vmem>>, vector<1x1x128xf32>
    tpu.vector_store %arg8[%c4_187, %c3_188, %c0_189], %330 {strides = array<i32>} : memref<8x4x128xf32, #tpu.memory_space<vmem>>, vector<1x1x128xf32>,
    %c40_i32 = arith.constant 40 : i32
    %332 = arith.addi %51, %c40_i32 : i32
    %333 = arith.index_cast %332 : i32 to index
    %334 = memref.load %arg1[%333] : memref<64xi32, #tpu.memory_space<smem>>
    %c1_i32_190 = arith.constant 1 : i32
    %335 = arith.addi %332, %c1_i32_190 : i32
    %336 = arith.index_cast %335 : i32 to index
    %337 = memref.load %arg1[%336] : memref<64xi32, #tpu.memory_space<smem>>
    %338 = arith.index_cast %334 : i32 to index
    %c0_191 = arith.constant 0 : index
    %339 = vector.load %arg5[%338, %c0_191] : memref<16x128xf32, #tpu.memory_space<vmem>>, vector<1x128xf32>
    %340 = vector.shape_cast %339 : vector<1x128xf32> to vector<1x1x128xf32>
    %c5 = arith.constant 5 : index
    %c0_192 = arith.constant 0 : index
    %c0_193 = arith.constant 0 : index
    %341 = vector.load %arg7[%c5, %c0_192, %c0_193] : memref<8x4x128xf32, #tpu.memory_space<vmem>>, vector<1x1x128xf32>
    tpu.vector_store %arg7[%c5, %c0_192, %c0_193], %340 {strides = array<i32>} : memref<8x4x128xf32, #tpu.memory_space<vmem>>, vector<1x1x128xf32>,
    %342 = arith.index_cast %337 : i32 to index
    %c0_194 = arith.constant 0 : index
    %343 = vector.load %arg5[%342, %c0_194] : memref<16x128xf32, #tpu.memory_space<vmem>>, vector<1x128xf32>
    %344 = vector.shape_cast %343 : vector<1x128xf32> to vector<1x1x128xf32>
    %c5_195 = arith.constant 5 : index
    %c0_196 = arith.constant 0 : index
    %c0_197 = arith.constant 0 : index
    %345 = vector.load %arg8[%c5_195, %c0_196, %c0_197] : memref<8x4x128xf32, #tpu.memory_space<vmem>>, vector<1x1x128xf32>
    tpu.vector_store %arg8[%c5_195, %c0_196, %c0_197], %344 {strides = array<i32>} : memref<8x4x128xf32, #tpu.memory_space<vmem>>, vector<1x1x128xf32>,
    %c42_i32 = arith.constant 42 : i32
    %346 = arith.addi %51, %c42_i32 : i32
    %347 = arith.index_cast %346 : i32 to index
    %348 = memref.load %arg1[%347] : memref<64xi32, #tpu.memory_space<smem>>
    %c1_i32_198 = arith.constant 1 : i32
    %349 = arith.addi %346, %c1_i32_198 : i32
    %350 = arith.index_cast %349 : i32 to index
    %351 = memref.load %arg1[%350] : memref<64xi32, #tpu.memory_space<smem>>
    %352 = arith.index_cast %348 : i32 to index
    %c0_199 = arith.constant 0 : index
    %353 = vector.load %arg5[%352, %c0_199] : memref<16x128xf32, #tpu.memory_space<vmem>>, vector<1x128xf32>
    %354 = vector.shape_cast %353 : vector<1x128xf32> to vector<1x1x128xf32>
    %c5_200 = arith.constant 5 : index
    %c1_201 = arith.constant 1 : index
    %c0_202 = arith.constant 0 : index
    %355 = vector.load %arg7[%c5_200, %c1_201, %c0_202] : memref<8x4x128xf32, #tpu.memory_space<vmem>>, vector<1x1x128xf32>
    tpu.vector_store %arg7[%c5_200, %c1_201, %c0_202], %354 {strides = array<i32>} : memref<8x4x128xf32, #tpu.memory_space<vmem>>, vector<1x1x128xf32>,
    %356 = arith.index_cast %351 : i32 to index
    %c0_203 = arith.constant 0 : index
    %357 = vector.load %arg5[%356, %c0_203] : memref<16x128xf32, #tpu.memory_space<vmem>>, vector<1x128xf32>
    %358 = vector.shape_cast %357 : vector<1x128xf32> to vector<1x1x128xf32>
    %c5_204 = arith.constant 5 : index
    %c1_205 = arith.constant 1 : index
    %c0_206 = arith.constant 0 : index
    %359 = vector.load %arg8[%c5_204, %c1_205, %c0_206] : memref<8x4x128xf32, #tpu.memory_space<vmem>>, vector<1x1x128xf32>
    tpu.vector_store %arg8[%c5_204, %c1_205, %c0_206], %358 {strides = array<i32>} : memref<8x4x128xf32, #tpu.memory_space<vmem>>, vector<1x1x128xf32>,
    %c44_i32 = arith.constant 44 : i32
    %360 = arith.addi %51, %c44_i32 : i32
    %361 = arith.index_cast %360 : i32 to index
    %362 = memref.load %arg1[%361] : memref<64xi32, #tpu.memory_space<smem>>
    %c1_i32_207 = arith.constant 1 : i32
    %363 = arith.addi %360, %c1_i32_207 : i32
    %364 = arith.index_cast %363 : i32 to index
    %365 = memref.load %arg1[%364] : memref<64xi32, #tpu.memory_space<smem>>
    %366 = arith.index_cast %362 : i32 to index
    %c0_208 = arith.constant 0 : index
    %367 = vector.load %arg5[%366, %c0_208] : memref<16x128xf32, #tpu.memory_space<vmem>>, vector<1x128xf32>
    %368 = vector.shape_cast %367 : vector<1x128xf32> to vector<1x1x128xf32>
    %c5_209 = arith.constant 5 : index
    %c2_210 = arith.constant 2 : index
    %c0_211 = arith.constant 0 : index
    %369 = vector.load %arg7[%c5_209, %c2_210, %c0_211] : memref<8x4x128xf32, #tpu.memory_space<vmem>>, vector<1x1x128xf32>
    tpu.vector_store %arg7[%c5_209, %c2_210, %c0_211], %368 {strides = array<i32>} : memref<8x4x128xf32, #tpu.memory_space<vmem>>, vector<1x1x128xf32>,
    %370 = arith.index_cast %365 : i32 to index
    %c0_212 = arith.constant 0 : index
    %371 = vector.load %arg5[%370, %c0_212] : memref<16x128xf32, #tpu.memory_space<vmem>>, vector<1x128xf32>
    %372 = vector.shape_cast %371 : vector<1x128xf32> to vector<1x1x128xf32>
    %c5_213 = arith.constant 5 : index
    %c2_214 = arith.constant 2 : index
    %c0_215 = arith.constant 0 : index
    %373 = vector.load %arg8[%c5_213, %c2_214, %c0_215] : memref<8x4x128xf32, #tpu.memory_space<vmem>>, vector<1x1x128xf32>
    tpu.vector_store %arg8[%c5_213, %c2_214, %c0_215], %372 {strides = array<i32>} : memref<8x4x128xf32, #tpu.memory_space<vmem>>, vector<1x1x128xf32>,
    %c46_i32 = arith.constant 46 : i32
    %374 = arith.addi %51, %c46_i32 : i32
    %375 = arith.index_cast %374 : i32 to index
    %376 = memref.load %arg1[%375] : memref<64xi32, #tpu.memory_space<smem>>
    %c1_i32_216 = arith.constant 1 : i32
    %377 = arith.addi %374, %c1_i32_216 : i32
    %378 = arith.index_cast %377 : i32 to index
    %379 = memref.load %arg1[%378] : memref<64xi32, #tpu.memory_space<smem>>
    %380 = arith.index_cast %376 : i32 to index
    %c0_217 = arith.constant 0 : index
    %381 = vector.load %arg5[%380, %c0_217] : memref<16x128xf32, #tpu.memory_space<vmem>>, vector<1x128xf32>
    %382 = vector.shape_cast %381 : vector<1x128xf32> to vector<1x1x128xf32>
    %c5_218 = arith.constant 5 : index
    %c3_219 = arith.constant 3 : index
    %c0_220 = arith.constant 0 : index
    %383 = vector.load %arg7[%c5_218, %c3_219, %c0_220] : memref<8x4x128xf32, #tpu.memory_space<vmem>>, vector<1x1x128xf32>
    tpu.vector_store %arg7[%c5_218, %c3_219, %c0_220], %382 {strides = array<i32>} : memref<8x4x128xf32, #tpu.memory_space<vmem>>, vector<1x1x128xf32>,
    %384 = arith.index_cast %379 : i32 to index
    %c0_221 = arith.constant 0 : index
    %385 = vector.load %arg5[%384, %c0_221] : memref<16x128xf32, #tpu.memory_space<vmem>>, vector<1x128xf32>
    %386 = vector.shape_cast %385 : vector<1x128xf32> to vector<1x1x128xf32>
    %c5_222 = arith.constant 5 : index
    %c3_223 = arith.constant 3 : index
    %c0_224 = arith.constant 0 : index
    %387 = vector.load %arg8[%c5_222, %c3_223, %c0_224] : memref<8x4x128xf32, #tpu.memory_space<vmem>>, vector<1x1x128xf32>
    tpu.vector_store %arg8[%c5_222, %c3_223, %c0_224], %386 {strides = array<i32>} : memref<8x4x128xf32, #tpu.memory_space<vmem>>, vector<1x1x128xf32>,
    %c48_i32 = arith.constant 48 : i32
    %388 = arith.addi %51, %c48_i32 : i32
    %389 = arith.index_cast %388 : i32 to index
    %390 = memref.load %arg1[%389] : memref<64xi32, #tpu.memory_space<smem>>
    %c1_i32_225 = arith.constant 1 : i32
    %391 = arith.addi %388, %c1_i32_225 : i32
    %392 = arith.index_cast %391 : i32 to index
    %393 = memref.load %arg1[%392] : memref<64xi32, #tpu.memory_space<smem>>
    %394 = arith.index_cast %390 : i32 to index
    %c0_226 = arith.constant 0 : index
    %395 = vector.load %arg5[%394, %c0_226] : memref<16x128xf32, #tpu.memory_space<vmem>>, vector<1x128xf32>
    %396 = vector.shape_cast %395 : vector<1x128xf32> to vector<1x1x128xf32>
    %c6 = arith.constant 6 : index
    %c0_227 = arith.constant 0 : index
    %c0_228 = arith.constant 0 : index
    %397 = vector.load %arg7[%c6, %c0_227, %c0_228] : memref<8x4x128xf32, #tpu.memory_space<vmem>>, vector<1x1x128xf32>
    tpu.vector_store %arg7[%c6, %c0_227, %c0_228], %396 {strides = array<i32>} : memref<8x4x128xf32, #tpu.memory_space<vmem>>, vector<1x1x128xf32>,
    %398 = arith.index_cast %393 : i32 to index
    %c0_229 = arith.constant 0 : index
    %399 = vector.load %arg5[%398, %c0_229] : memref<16x128xf32, #tpu.memory_space<vmem>>, vector<1x128xf32>
    %400 = vector.shape_cast %399 : vector<1x128xf32> to vector<1x1x128xf32>
    %c6_230 = arith.constant 6 : index
    %c0_231 = arith.constant 0 : index
    %c0_232 = arith.constant 0 : index
    %401 = vector.load %arg8[%c6_230, %c0_231, %c0_232] : memref<8x4x128xf32, #tpu.memory_space<vmem>>, vector<1x1x128xf32>
    tpu.vector_store %arg8[%c6_230, %c0_231, %c0_232], %400 {strides = array<i32>} : memref<8x4x128xf32, #tpu.memory_space<vmem>>, vector<1x1x128xf32>,
    %c50_i32 = arith.constant 50 : i32
    %402 = arith.addi %51, %c50_i32 : i32
    %403 = arith.index_cast %402 : i32 to index
    %404 = memref.load %arg1[%403] : memref<64xi32, #tpu.memory_space<smem>>
    %c1_i32_233 = arith.constant 1 : i32
    %405 = arith.addi %402, %c1_i32_233 : i32
    %406 = arith.index_cast %405 : i32 to index
    %407 = memref.load %arg1[%406] : memref<64xi32, #tpu.memory_space<smem>>
    %408 = arith.index_cast %404 : i32 to index
    %c0_234 = arith.constant 0 : index
    %409 = vector.load %arg5[%408, %c0_234] : memref<16x128xf32, #tpu.memory_space<vmem>>, vector<1x128xf32>
    %410 = vector.shape_cast %409 : vector<1x128xf32> to vector<1x1x128xf32>
    %c6_235 = arith.constant 6 : index
    %c1_236 = arith.constant 1 : index
    %c0_237 = arith.constant 0 : index
    %411 = vector.load %arg7[%c6_235, %c1_236, %c0_237] : memref<8x4x128xf32, #tpu.memory_space<vmem>>, vector<1x1x128xf32>
    tpu.vector_store %arg7[%c6_235, %c1_236, %c0_237], %410 {strides = array<i32>} : memref<8x4x128xf32, #tpu.memory_space<vmem>>, vector<1x1x128xf32>,
    %412 = arith.index_cast %407 : i32 to index
    %c0_238 = arith.constant 0 : index
    %413 = vector.load %arg5[%412, %c0_238] : memref<16x128xf32, #tpu.memory_space<vmem>>, vector<1x128xf32>
    %414 = vector.shape_cast %413 : vector<1x128xf32> to vector<1x1x128xf32>
    %c6_239 = arith.constant 6 : index
    %c1_240 = arith.constant 1 : index
    %c0_241 = arith.constant 0 : index
    %415 = vector.load %arg8[%c6_239, %c1_240, %c0_241] : memref<8x4x128xf32, #tpu.memory_space<vmem>>, vector<1x1x128xf32>
    tpu.vector_store %arg8[%c6_239, %c1_240, %c0_241], %414 {strides = array<i32>} : memref<8x4x128xf32, #tpu.memory_space<vmem>>, vector<1x1x128xf32>,
    %c52_i32 = arith.constant 52 : i32
    %416 = arith.addi %51, %c52_i32 : i32
    %417 = arith.index_cast %416 : i32 to index
    %418 = memref.load %arg1[%417] : memref<64xi32, #tpu.memory_space<smem>>
    %c1_i32_242 = arith.constant 1 : i32
    %419 = arith.addi %416, %c1_i32_242 : i32
    %420 = arith.index_cast %419 : i32 to index
    %421 = memref.load %arg1[%420] : memref<64xi32, #tpu.memory_space<smem>>
    %422 = arith.index_cast %418 : i32 to index
    %c0_243 = arith.constant 0 : index
    %423 = vector.load %arg5[%422, %c0_243] : memref<16x128xf32, #tpu.memory_space<vmem>>, vector<1x128xf32>
    %424 = vector.shape_cast %423 : vector<1x128xf32> to vector<1x1x128xf32>
    %c6_244 = arith.constant 6 : index
    %c2_245 = arith.constant 2 : index
    %c0_246 = arith.constant 0 : index
    %425 = vector.load %arg7[%c6_244, %c2_245, %c0_246] : memref<8x4x128xf32, #tpu.memory_space<vmem>>, vector<1x1x128xf32>
    tpu.vector_store %arg7[%c6_244, %c2_245, %c0_246], %424 {strides = array<i32>} : memref<8x4x128xf32, #tpu.memory_space<vmem>>, vector<1x1x128xf32>,
    %426 = arith.index_cast %421 : i32 to index
    %c0_247 = arith.constant 0 : index
    %427 = vector.load %arg5[%426, %c0_247] : memref<16x128xf32, #tpu.memory_space<vmem>>, vector<1x128xf32>
    %428 = vector.shape_cast %427 : vector<1x128xf32> to vector<1x1x128xf32>
    %c6_248 = arith.constant 6 : index
    %c2_249 = arith.constant 2 : index
    %c0_250 = arith.constant 0 : index
    %429 = vector.load %arg8[%c6_248, %c2_249, %c0_250] : memref<8x4x128xf32, #tpu.memory_space<vmem>>, vector<1x1x128xf32>
    tpu.vector_store %arg8[%c6_248, %c2_249, %c0_250], %428 {strides = array<i32>} : memref<8x4x128xf32, #tpu.memory_space<vmem>>, vector<1x1x128xf32>,
    %c54_i32 = arith.constant 54 : i32
    %430 = arith.addi %51, %c54_i32 : i32
    %431 = arith.index_cast %430 : i32 to index
    %432 = memref.load %arg1[%431] : memref<64xi32, #tpu.memory_space<smem>>
    %c1_i32_251 = arith.constant 1 : i32
    %433 = arith.addi %430, %c1_i32_251 : i32
    %434 = arith.index_cast %433 : i32 to index
    %435 = memref.load %arg1[%434] : memref<64xi32, #tpu.memory_space<smem>>
    %436 = arith.index_cast %432 : i32 to index
    %c0_252 = arith.constant 0 : index
    %437 = vector.load %arg5[%436, %c0_252] : memref<16x128xf32, #tpu.memory_space<vmem>>, vector<1x128xf32>
    %438 = vector.shape_cast %437 : vector<1x128xf32> to vector<1x1x128xf32>
    %c6_253 = arith.constant 6 : index
    %c3_254 = arith.constant 3 : index
    %c0_255 = arith.constant 0 : index
    %439 = vector.load %arg7[%c6_253, %c3_254, %c0_255] : memref<8x4x128xf32, #tpu.memory_space<vmem>>, vector<1x1x128xf32>
    tpu.vector_store %arg7[%c6_253, %c3_254, %c0_255], %438 {strides = array<i32>} : memref<8x4x128xf32, #tpu.memory_space<vmem>>, vector<1x1x128xf32>,
    %440 = arith.index_cast %435 : i32 to index
    %c0_256 = arith.constant 0 : index
    %441 = vector.load %arg5[%440, %c0_256] : memref<16x128xf32, #tpu.memory_space<vmem>>, vector<1x128xf32>
    %442 = vector.shape_cast %441 : vector<1x128xf32> to vector<1x1x128xf32>
    %c6_257 = arith.constant 6 : index
    %c3_258 = arith.constant 3 : index
    %c0_259 = arith.constant 0 : index
    %443 = vector.load %arg8[%c6_257, %c3_258, %c0_259] : memref<8x4x128xf32, #tpu.memory_space<vmem>>, vector<1x1x128xf32>
    tpu.vector_store %arg8[%c6_257, %c3_258, %c0_259], %442 {strides = array<i32>} : memref<8x4x128xf32, #tpu.memory_space<vmem>>, vector<1x1x128xf32>,
    %c56_i32 = arith.constant 56 : i32
    %444 = arith.addi %51, %c56_i32 : i32
    %445 = arith.index_cast %444 : i32 to index
    %446 = memref.load %arg1[%445] : memref<64xi32, #tpu.memory_space<smem>>
    %c1_i32_260 = arith.constant 1 : i32
    %447 = arith.addi %444, %c1_i32_260 : i32
    %448 = arith.index_cast %447 : i32 to index
    %449 = memref.load %arg1[%448] : memref<64xi32, #tpu.memory_space<smem>>
    %450 = arith.index_cast %446 : i32 to index
    %c0_261 = arith.constant 0 : index
    %451 = vector.load %arg5[%450, %c0_261] : memref<16x128xf32, #tpu.memory_space<vmem>>, vector<1x128xf32>
    %452 = vector.shape_cast %451 : vector<1x128xf32> to vector<1x1x128xf32>
    %c7 = arith.constant 7 : index
    %c0_262 = arith.constant 0 : index
    %c0_263 = arith.constant 0 : index
    %453 = vector.load %arg7[%c7, %c0_262, %c0_263] : memref<8x4x128xf32, #tpu.memory_space<vmem>>, vector<1x1x128xf32>
    tpu.vector_store %arg7[%c7, %c0_262, %c0_263], %452 {strides = array<i32>} : memref<8x4x128xf32, #tpu.memory_space<vmem>>, vector<1x1x128xf32>,
    %454 = arith.index_cast %449 : i32 to index
    %c0_264 = arith.constant 0 : index
    %455 = vector.load %arg5[%454, %c0_264] : memref<16x128xf32, #tpu.memory_space<vmem>>, vector<1x128xf32>
    %456 = vector.shape_cast %455 : vector<1x128xf32> to vector<1x1x128xf32>
    %c7_265 = arith.constant 7 : index
    %c0_266 = arith.constant 0 : index
    %c0_267 = arith.constant 0 : index
    %457 = vector.load %arg8[%c7_265, %c0_266, %c0_267] : memref<8x4x128xf32, #tpu.memory_space<vmem>>, vector<1x1x128xf32>
    tpu.vector_store %arg8[%c7_265, %c0_266, %c0_267], %456 {strides = array<i32>} : memref<8x4x128xf32, #tpu.memory_space<vmem>>, vector<1x1x128xf32>,
    %c58_i32 = arith.constant 58 : i32
    %458 = arith.addi %51, %c58_i32 : i32
    %459 = arith.index_cast %458 : i32 to index
    %460 = memref.load %arg1[%459] : memref<64xi32, #tpu.memory_space<smem>>
    %c1_i32_268 = arith.constant 1 : i32
    %461 = arith.addi %458, %c1_i32_268 : i32
    %462 = arith.index_cast %461 : i32 to index
    %463 = memref.load %arg1[%462] : memref<64xi32, #tpu.memory_space<smem>>
    %464 = arith.index_cast %460 : i32 to index
    %c0_269 = arith.constant 0 : index
    %465 = vector.load %arg5[%464, %c0_269] : memref<16x128xf32, #tpu.memory_space<vmem>>, vector<1x128xf32>
    %466 = vector.shape_cast %465 : vector<1x128xf32> to vector<1x1x128xf32>
    %c7_270 = arith.constant 7 : index
    %c1_271 = arith.constant 1 : index
    %c0_272 = arith.constant 0 : index
    %467 = vector.load %arg7[%c7_270, %c1_271, %c0_272] : memref<8x4x128xf32, #tpu.memory_space<vmem>>, vector<1x1x128xf32>
    tpu.vector_store %arg7[%c7_270, %c1_271, %c0_272], %466 {strides = array<i32>} : memref<8x4x128xf32, #tpu.memory_space<vmem>>, vector<1x1x128xf32>,
    %468 = arith.index_cast %463 : i32 to index
    %c0_273 = arith.constant 0 : index
    %469 = vector.load %arg5[%468, %c0_273] : memref<16x128xf32, #tpu.memory_space<vmem>>, vector<1x128xf32>
    %470 = vector.shape_cast %469 : vector<1x128xf32> to vector<1x1x128xf32>
    %c7_274 = arith.constant 7 : index
    %c1_275 = arith.constant 1 : index
    %c0_276 = arith.constant 0 : index
    %471 = vector.load %arg8[%c7_274, %c1_275, %c0_276] : memref<8x4x128xf32, #tpu.memory_space<vmem>>, vector<1x1x128xf32>
    tpu.vector_store %arg8[%c7_274, %c1_275, %c0_276], %470 {strides = array<i32>} : memref<8x4x128xf32, #tpu.memory_space<vmem>>, vector<1x1x128xf32>,
    %c60_i32 = arith.constant 60 : i32
    %472 = arith.addi %51, %c60_i32 : i32
    %473 = arith.index_cast %472 : i32 to index
    %474 = memref.load %arg1[%473] : memref<64xi32, #tpu.memory_space<smem>>
    %c1_i32_277 = arith.constant 1 : i32
    %475 = arith.addi %472, %c1_i32_277 : i32
    %476 = arith.index_cast %475 : i32 to index
    %477 = memref.load %arg1[%476] : memref<64xi32, #tpu.memory_space<smem>>
    %478 = arith.index_cast %474 : i32 to index
    %c0_278 = arith.constant 0 : index
    %479 = vector.load %arg5[%478, %c0_278] : memref<16x128xf32, #tpu.memory_space<vmem>>, vector<1x128xf32>
    %480 = vector.shape_cast %479 : vector<1x128xf32> to vector<1x1x128xf32>
    %c7_279 = arith.constant 7 : index
    %c2_280 = arith.constant 2 : index
    %c0_281 = arith.constant 0 : index
    %481 = vector.load %arg7[%c7_279, %c2_280, %c0_281] : memref<8x4x128xf32, #tpu.memory_space<vmem>>, vector<1x1x128xf32>
    tpu.vector_store %arg7[%c7_279, %c2_280, %c0_281], %480 {strides = array<i32>} : memref<8x4x128xf32, #tpu.memory_space<vmem>>, vector<1x1x128xf32>,
    %482 = arith.index_cast %477 : i32 to index
    %c0_282 = arith.constant 0 : index
    %483 = vector.load %arg5[%482, %c0_282] : memref<16x128xf32, #tpu.memory_space<vmem>>, vector<1x128xf32>
    %484 = vector.shape_cast %483 : vector<1x128xf32> to vector<1x1x128xf32>
    %c7_283 = arith.constant 7 : index
    %c2_284 = arith.constant 2 : index
    %c0_285 = arith.constant 0 : index
    %485 = vector.load %arg8[%c7_283, %c2_284, %c0_285] : memref<8x4x128xf32, #tpu.memory_space<vmem>>, vector<1x1x128xf32>
    tpu.vector_store %arg8[%c7_283, %c2_284, %c0_285], %484 {strides = array<i32>} : memref<8x4x128xf32, #tpu.memory_space<vmem>>, vector<1x1x128xf32>,
    %c62_i32 = arith.constant 62 : i32
    %486 = arith.addi %51, %c62_i32 : i32
    %487 = arith.index_cast %486 : i32 to index
    %488 = memref.load %arg1[%487] : memref<64xi32, #tpu.memory_space<smem>>
    %c1_i32_286 = arith.constant 1 : i32
    %489 = arith.addi %486, %c1_i32_286 : i32
    %490 = arith.index_cast %489 : i32 to index
    %491 = memref.load %arg1[%490] : memref<64xi32, #tpu.memory_space<smem>>
    %492 = arith.index_cast %488 : i32 to index
    %c0_287 = arith.constant 0 : index
    %493 = vector.load %arg5[%492, %c0_287] : memref<16x128xf32, #tpu.memory_space<vmem>>, vector<1x128xf32>
    %494 = vector.shape_cast %493 : vector<1x128xf32> to vector<1x1x128xf32>
    %c7_288 = arith.constant 7 : index
    %c3_289 = arith.constant 3 : index
    %c0_290 = arith.constant 0 : index
    %495 = vector.load %arg7[%c7_288, %c3_289, %c0_290] : memref<8x4x128xf32, #tpu.memory_space<vmem>>, vector<1x1x128xf32>
    tpu.vector_store %arg7[%c7_288, %c3_289, %c0_290], %494 {strides = array<i32>} : memref<8x4x128xf32, #tpu.memory_space<vmem>>, vector<1x1x128xf32>,
    %496 = arith.index_cast %491 : i32 to index
    %c0_291 = arith.constant 0 : index
    %497 = vector.load %arg5[%496, %c0_291] : memref<16x128xf32, #tpu.memory_space<vmem>>, vector<1x128xf32>
    %498 = vector.shape_cast %497 : vector<1x128xf32> to vector<1x1x128xf32>
    %c7_292 = arith.constant 7 : index
    %c3_293 = arith.constant 3 : index
    %c0_294 = arith.constant 0 : index
    %499 = vector.load %arg8[%c7_292, %c3_293, %c0_294] : memref<8x4x128xf32, #tpu.memory_space<vmem>>, vector<1x1x128xf32>
    tpu.vector_store %arg8[%c7_292, %c3_293, %c0_294], %498 {strides = array<i32>} : memref<8x4x128xf32, #tpu.memory_space<vmem>>, vector<1x1x128xf32>,
    %c0_295 = arith.constant 0 : index
    %c0_296 = arith.constant 0 : index
    %c0_297 = arith.constant 0 : index
    %500 = vector.load %arg7[%c0_295, %c0_296, %c0_297] : memref<8x4x128xf32, #tpu.memory_space<vmem>>, vector<8x4x128xf32>
    %501 = arith.mulf %500, %500 : vector<8x4x128xf32>
    %cst_298 = arith.constant dense<0.000000e+00> : vector<8x4xf32>
    %502 = vector.multi_reduction <add>, %501, %cst_298 [2] : vector<8x4x128xf32> to vector<8x4xf32>
    %503 = vector.shape_cast %502 : vector<8x4xf32> to vector<8x4x1xf32>
    %cst_299 = arith.constant 1.000000e-24 : f32
    %504 = vector.broadcast %cst_299 : f32 to vector<8x4x1xf32>
    %505 = arith.maximumf %503, %504 : vector<8x4x1xf32>
    %506 = math.rsqrt %505 : vector<8x4x1xf32>
    %507 = vector.broadcast %506 : vector<8x4x1xf32> to vector<8x4x128xf32>
    %508 = arith.mulf %500, %507 : vector<8x4x128xf32>
    %c0_300 = arith.constant 0 : index
    %c0_301 = arith.constant 0 : index
    %c0_302 = arith.constant 0 : index
    %509 = vector.load %arg8[%c0_300, %c0_301, %c0_302] : memref<8x4x128xf32, #tpu.memory_space<vmem>>, vector<8x4x128xf32>
    %510 = arith.mulf %509, %509 : vector<8x4x128xf32>
    %cst_303 = arith.constant dense<0.000000e+00> : vector<8x4xf32>
    %511 = vector.multi_reduction <add>, %510, %cst_303 [2] : vector<8x4x128xf32> to vector<8x4xf32>
    %512 = vector.shape_cast %511 : vector<8x4xf32> to vector<8x4x1xf32>
    %cst_304 = arith.constant 1.000000e-24 : f32
    %513 = vector.broadcast %cst_304 : f32 to vector<8x4x1xf32>
    %514 = arith.maximumf %512, %513 : vector<8x4x1xf32>
    %515 = math.rsqrt %514 : vector<8x4x1xf32>
    %516 = vector.broadcast %515 : vector<8x4x1xf32> to vector<8x4x128xf32>
    %517 = arith.mulf %509, %516 : vector<8x4x128xf32>
    %518 = vector.shape_cast %26 : vector<8x128xf32> to vector<8x1x128xf32>
    %519 = vector.broadcast %518 : vector<8x1x128xf32> to vector<8x4x128xf32>
    %520 = arith.addf %508, %519 : vector<8x4x128xf32>
    %521 = arith.subf %520, %517 : vector<8x4x128xf32>
    %522 = math.absf %521 : vector<8x4x128xf32>
    %cst_305 = arith.constant dense<0.000000e+00> : vector<8x4xf32>
    %523 = vector.multi_reduction <add>, %522, %cst_305 [2] : vector<8x4x128xf32> to vector<8x4xf32>
    %cst_306 = arith.constant 0.000000e+00 : f32
    %524 = vector.broadcast %cst_306 : f32 to vector<8x4xf32>
    %525 = arith.subf %524, %523 : vector<8x4xf32>
    %cst_307 = arith.constant 1.000000e+00 : f32
    %526 = vector.broadcast %cst_307 : f32 to vector<8x1xf32>
    %527 = arith.subf %526, %33 : vector<8x1xf32>
    %528 = vector.broadcast %527 : vector<8x1xf32> to vector<8x4xf32>
    %529 = arith.addf %528, %525 : vector<8x4xf32>
    %cst_308 = arith.constant 0.000000e+00 : f32
    %530 = vector.broadcast %cst_308 : f32 to vector<8x4xf32>
    %531 = arith.maximumf %529, %530 : vector<8x4xf32>
    %532 = vector.shape_cast %531 : vector<8x4xf32> to vector<1x8x4xf32>
    %cst_309 = arith.constant dense<0.000000e+00> : vector<1xf32>
    %533 = vector.multi_reduction <add>, %532, %cst_309 [1, 2] : vector<1x8x4xf32> to vector<1xf32>
    %534 = vector.shape_cast %533 : vector<1xf32> to vector<1x1x1xf32>
    %535 = vector.extract %534[0, 0, 0] : f32 from vector<1x1x1xf32>
    %536 = tpu.iota {dimensions = array<i32: 1>} : vector<1x8x128xi32>
    %537 = tpu.iota {dimensions = array<i32: 2>} : vector<1x8x128xi32>
    %c0_i32_310 = arith.constant 0 : i32
    %538 = vector.broadcast %c0_i32_310 : i32 to vector<1x8x128xi32>
    %539 = arith.cmpi eq, %536, %538 : vector<1x8x128xi32>
    %c0_i32_311 = arith.constant 0 : i32
    %540 = vector.broadcast %c0_i32_311 : i32 to vector<1x8x128xi32>
    %541 = arith.cmpi eq, %537, %540 : vector<1x8x128xi32>
    %542 = arith.andi %539, %541 : vector<1x8x128xi1>
    %cst_312 = arith.constant 0.000000e+00 : f32
    %543 = vector.broadcast %535 : f32 to vector<1x8x128xf32>
    %544 = vector.broadcast %cst_312 : f32 to vector<1x8x128xf32>
    %545 = arith.select %542, %543, %544 : vector<1x8x128xi1>, vector<1x8x128xf32>
    %c0_i32_313 = arith.constant 0 : i32
    %546 = vector.broadcast %c0_i32_313 : i32 to vector<1x8x128xi32>
    %547 = arith.cmpi eq, %536, %546 : vector<1x8x128xi32>
    %c1_i32_314 = arith.constant 1 : i32
    %548 = vector.broadcast %c1_i32_314 : i32 to vector<1x8x128xi32>
    %549 = arith.cmpi eq, %537, %548 : vector<1x8x128xi32>
    %550 = arith.andi %547, %549 : vector<1x8x128xi1>
    %551 = vector.broadcast %50 : f32 to vector<1x8x128xf32>
    %552 = arith.select %550, %551, %545 : vector<1x8x128xi1>, vector<1x8x128xf32>
    %c0_315 = arith.constant 0 : index
    %c0_316 = arith.constant 0 : index
    %c0_317 = arith.constant 0 : index
    %553 = vector.load %arg6[%c0_315, %c0_316, %c0_317] : memref<1x8x128xf32, #tpu.memory_space<vmem>>, vector<1x8x128xf32>
    tpu.vector_store %arg6[%c0_315, %c0_316, %c0_317], %552 {strides = array<i32>} : memref<1x8x128xf32, #tpu.memory_space<vmem>>, vector<1x8x128xf32>,
    return
  }
  func.func @transform_0(%arg0: i32, %arg1: memref<64xi32, #tpu.memory_space<smem>>) -> (i32, i32) {
    %c0_i32 = arith.constant 0 : i32
    %c0_i32_0 = arith.constant 0 : i32
    return %arg0, %c0_i32 : i32, i32
  }
  func.func @transform_1(%arg0: i32, %arg1: memref<64xi32, #tpu.memory_space<smem>>) -> (i32, i32) {
    %c0_i32 = arith.constant 0 : i32
    %c0_i32_0 = arith.constant 0 : i32
    return %arg0, %c0_i32 : i32, i32
  }
  func.func @transform_2(%arg0: i32, %arg1: memref<64xi32, #tpu.memory_space<smem>>) -> (i32, i32) {
    %c0_i32 = arith.constant 0 : i32
    %c0_i32_0 = arith.constant 0 : i32
    return %arg0, %c0_i32 : i32, i32
  }
  func.func @transform_3(%arg0: i32, %arg1: memref<64xi32, #tpu.memory_space<smem>>) -> (i32, i32) {
    %c0_i32 = arith.constant 0 : i32
    %c0_i32_0 = arith.constant 0 : i32
    %c0_i32_1 = arith.constant 0 : i32
    return %c0_i32, %c0_i32_0 : i32, i32
  }
  func.func @transform_4(%arg0: i32, %arg1: memref<64xi32, #tpu.memory_space<smem>>) -> (i32, i32, i32) {
    %c0_i32 = arith.constant 0 : i32
    %c0_i32_0 = arith.constant 0 : i32
    %c0_i32_1 = arith.constant 0 : i32
    return %arg0, %c0_i32, %c0_i32_0 : i32, i32, i32
  }
}

</mosaic_0001>

<bundles_post_ra>
// kernel: tpu_custom_call.1
= control target key start
LH: loop header
LB: loop body
LE: loop exit
PB: predicated region body
PF: predicated region fallthrough
CT: control target
= control target key end

     0   :  { %s1551_s0 = inlined_call_operand.hbm [shape: s32[64], index: 0, kind: input, shape index: {}]   ;;  %s1552_s1 = inlined_call_operand.hbm [shape: f32[8,128], index: 1, kind: input, shape index: {}]   ;;  %s1553_s2 = inlined_call_operand.hbm [shape: f32[8,128], index: 2, kind: input, shape index: {}]   ;;  %s1554_s3 = inlined_call_operand.hbm [shape: f32[8,128], index: 3, kind: input, shape index: {}]   ;;  %s1555_s4 = inlined_call_operand.hbm [shape: f32[16,128], index: 4, kind: input, shape index: {}]   ;;  %s1556_s5 = inlined_call_operand.hbm [shape: f32[1,8,128], index: 5, kind: output, shape index: {}]  }
   0x1   :  { %s1022_s20 = scalar_lea.hbm %s1551_s0, 16 }
   0x2   :  { %p1023_p0 = scmp.ne.s32.totalorder %s1551_s0, %s1022_s20  ;;  %p1026_p1 = scmp.lt.u32.totalorder %s1022_s20, %s1551_s0 }
   0x4   :  { %p1028_p2 = pnand %p1026_p1, %p1023_p0 }
   0x6   :  { %1031 = shalt.err (!%p1028_p2)  }
   0x7   :  { %s1152_s25 = smov [#allocation5]  }
   0x8   :  { %11 = dma.hbm_to_smem %s1551_s0, 16, %s1152_s25, [#allocation4] }
   0x9   :  { %1142 = dma.done.wait [#allocation4], 16 }
   0xa   :  { %1143 = vsyncadd [#allocation4], 4294967280 }
   0xb   :  { %13 = sfence }
   0xc   :  { %14 = vsyncpa [#allocation7], 0 }
   0xd   :  { %15 = vsyncpa [#allocation10], 0 }
   0xe   :  { %16 = vsyncpa [#allocation13], 0 }
   0xf   :  { %17 = vsyncpa [#allocation8], 0  ;;  %s1153_s28 = smov [#allocation9]   ;;  %s1154_s30 = smov [#allocation6]  }
  0x10   :  { %s34_s29 = sshll.u32 %s1153_s28, 4  ;;  %s24_s6 = sshll.u32 %s1154_s30, 4  ;;  %s35_s29 = int_to_ptr.vmem [resolvable:$true] %s34_s29  ;;  %s25_s6 = int_to_ptr.vmem [resolvable:$true] %s24_s6 }
  0x11   :  { %s1032_s9 = scalar_lea.hbm %s1553_s2, 128 }
  0x12   :  { %p1033_p3 = scmp.ne.s32.totalorder %s1553_s2, %s1032_s9  ;;  %p1036_p4 = scmp.lt.u32.totalorder %s1032_s9, %s1553_s2 }
  0x14   :  { %p1038_p5 = pnand %p1036_p4, %p1033_p3 }
  0x16   :  { %1041 = shalt.err (!%p1038_p5)
}
  0x17   :  { %s1042_s13 = scalar_lea.vmem %s35_s29, 128  ;;  %p1047_p7 = scmp.lt.s32.totalorder %s35_s29, %s35_s29 }
  0x18   :  { %p1043_p6 = scmp.ne.s32.totalorder %s35_s29, %s1042_s13  ;;  %p1048_p8 = scmp.lt.s32.totalorder %s1042_s13, %s1042_s13 }
  0x1a   :  { %p1049_p9 = por %p1048_p8, %p1047_p7 }
  0x1c   :  { %p1050_p10 = pnand %p1049_p9, %p1043_p6 }
  0x1e   :  { %1053 = shalt.err (!%p1050_p10)
}
  0x1f   :  { %37 = dma.hbm_to_vmem [thread:$0]  %s1553_s2, 128, %s35_s29, [#allocation10]  }
  0x20   :  { %s1054_s18 = scalar_lea.hbm %s1552_s1, 128 }
  0x21   :  { %p1055_p11 = scmp.ne.s32.totalorder %s1552_s1, %s1054_s18  ;;  %p1058_p12 = scmp.lt.u32.totalorder %s1054_s18, %s1552_s1 }
  0x23   :  { %p1060_p13 = pnand %p1058_p12, %p1055_p11 }
  0x25   :  { %1063 = shalt.err (!%p1060_p13)
}
  0x26   :  { %s1064_s23 = scalar_lea.vmem %s25_s6, 128  ;;  %p1069_p1 = scmp.lt.s32.totalorder %s25_s6, %s25_s6 }
  0x27   :  { %p1065_p0 = scmp.ne.s32.totalorder %s25_s6, %s1064_s23  ;;  %p1070_p2 = scmp.lt.s32.totalorder %s1064_s23, %s1064_s23 }
  0x29   :  { %p1071_p3 = por %p1070_p2, %p1069_p1 }
  0x2b   :  { %p1072_p4 = pnand %p1071_p3, %p1065_p0 }
  0x2d   :  { %1075 = shalt.err (!%p1072_p4)
}
  0x2e   :  { %27 = dma.hbm_to_vmem [thread:$0]  %s1552_s1, 128, %s25_s6, [#allocation7]  }
  0x2f   :  { %s1155_s25 = smov [#allocation11]   ;;  %s1156_s27 = smov [#allocation12]  }
  0x30   :  { %s44_s26 = sshll.u32 %s1155_s25, 4  ;;  %s53_s28 = sshll.u32 %s1156_s27, 4  ;;  %s45_s26 = int_to_ptr.vmem [resolvable:$true] %s44_s26  ;;  %s1227_s28 = int_to_ptr.vmem [resolvable:$true] %s53_s28 }
  0x31   :  { %s1076_s7 = scalar_lea.hbm %s1554_s3, 128 }
  0x32   :  { %p1077_p5 = scmp.ne.s32.totalorder %s1554_s3, %s1076_s7  ;;  %p1080_p6 = scmp.lt.u32.totalorder %s1076_s7, %s1554_s3 }
  0x34   :  { %p1082_p7 = pnand %p1080_p6, %p1077_p5 }
  0x36   :  { %1085 = shalt.err (!%p1082_p7)
}
  0x37   :  { %s1086_s1 = scalar_lea.vmem %s45_s26, 128  ;;  %p1091_p9 = scmp.lt.s32.totalorder %s45_s26, %s45_s26 }
  0x38   :  { %p1087_p8 = scmp.ne.s32.totalorder %s45_s26, %s1086_s1  ;;  %p1092_p10 = scmp.lt.s32.totalorder %s1086_s1, %s1086_s1 }
  0x3a   :  { %p1093_p11 = por %p1092_p10, %p1091_p9 }
  0x3c   :  { %p1094_p12 = pnand %p1093_p11, %p1087_p8 }
  0x3e   :  { %1097 = shalt.err (!%p1094_p12)
}
  0x3f   :  { %47 = dma.hbm_to_vmem [thread:$0]  %s1554_s3, 128, %s45_s26, [#allocation10]  }
  0x40   :  { %s1098_s14 = scalar_lea.hbm %s1555_s4, 256 }
  0x41   :  { %p1099_p13 = scmp.ne.s32.totalorder %s1555_s4, %s1098_s14  ;;  %p1102_p0 = scmp.lt.u32.totalorder %s1098_s14, %s1555_s4 }
  0x43   :  { %p1104_p1 = pnand %p1102_p0, %p1099_p13 }
  0x45   :  { %1107 = shalt.err (!%p1104_p1)
}
  0x46   :  { %s1108_s19 = scalar_lea.vmem %s1227_s28, 256  ;;  %p1113_p3 = scmp.lt.s32.totalorder %s1227_s28, %s1227_s28 }
  0x47   :  { %p1109_p2 = scmp.ne.s32.totalorder %s1227_s28, %s1108_s19  ;;  %p1114_p4 = scmp.lt.s32.totalorder %s1108_s19, %s1108_s19 }
  0x49   :  { %p1115_p5 = por %p1114_p4, %p1113_p3 }
  0x4b   :  { %p1116_p6 = pnand %p1115_p5, %p1109_p2 }
  0x4d   :  { %1119 = shalt.err (!%p1116_p6)
}
  0x4e   :  { %s1157_s3 = smov 128   ;;  %s1158_s20 = smov 8  }
  0x4f   :  { %59 = dma.hbm_to_vmem [thread:$0]  %s1555_s4, 256, %s1227_s28, [#allocation13], %s1157_s3, %s1157_s3, %s1158_s20  }
  0x50   :  { %1144 = dma.done.wait [#allocation7], 128  }
  0x51   :  { %1145 = vsyncadd [#allocation7], 4294967168 }
  0x52   :  { %1146 = dma.done.wait [#allocation10], 256  }
  0x53   :  { %1147 = vsyncadd [#allocation10], 4294967040 }
  0x54   :  { %1148 = dma.done.wait [#allocation13], 256  }
  0x55   :  { %1149 = vsyncadd [#allocation13], 4294967040  ;;  %s911_s23 = sld [smem:[#allocation5 + $0x8]]  ;;  %s913_s2 = sld [smem:[#allocation5 + $0xa]]  ;;  %v1268_v0 = vld [vmem:[#allocation11] sm:$0xff]  ;;  %vm481_vm0 = vcmask 1043456  }
  0x56   :  { %s915_s24 = sld [smem:[#allocation5 + $0xc]]  ;;  %s917_s25 = sld [smem:[#allocation5 + $0xe]]  ;;  %v87_v1 = vmul.f32 %v1268_v0, %v1268_v0  ;;  %vm783_vm1 = vcmask 1041409   ;;  %vm785_vm2 = vcmask 1042434   ;;  %vm787_vm3 = vcmask 1043459  }
  0x57   :  { %s132_s26 = sld [smem:[#allocation5]]  ;;  %s905_s27 = sld [smem:[#allocation5 + $0x2]]  ;;  %vm789_vm4 = vcmask 1044484   ;;  %vm791_vm5 = vcmask 1045509   ;;  %vm793_vm6 = vcmask 1046534   ;;  %vm795_vm7 = vcmask 1047559  }
  0x58   :  { %s907_s29 = sld [smem:[#allocation5 + $0x4]]  ;;  %s1258_s30 = sld [smem:[#allocation5 + $0x6]]  ;;  %88 = vadd.xlane.f32.xlu0 %v87_v1  ;;  %vm800_vm8 = vcmask 31744  }
  0x59   :  { %s1260_s7 = sld [smem:[#allocation5 + $0x10]]  ;;  %s1262_s8 = sld [smem:[#allocation5 + $0x12]] }
  0x5a   :  { %s1264_s4 = sld [smem:[#allocation5 + $0x14]]  ;;  %s1266_s28 = sld [smem:[#allocation5 + $0x16]] }
  0x5b   :  { %s175_s9 = scalar_lea.vmem [#allocation12], %s911_s23  ;;  %s187_s10 = scalar_lea.vmem [#allocation12], %s913_s2 }
  0x5c   :  { %v176_v2 = vld [vmem:[%s175_s9] sm:$0x1]  ;;  %s197_s11 = scalar_lea.vmem [#allocation12], %s915_s24  ;;  %s207_s1 = scalar_lea.vmem [#allocation12], %s917_s25 }
  0x5d   :  { %v188_v3 = vld [vmem:[%s187_s10] sm:$0x1]  ;;  %178 = vst [vmem:[#allocation2 + $0x4] sm:$0x1] %v176_v2  ;;  %s135_s6 = scalar_lea.vmem [#allocation12], %s132_s26  ;;  %s145_s0 = scalar_lea.vmem [#allocation12], %s905_s27 }
  0x5e   :  { %189 = vst [vmem:[#allocation2 + $0x5] sm:$0x1] %v188_v3  ;;  %v198_v4 = vld [vmem:[%s197_s11] sm:$0x1]  ;;  %s155_s12 = scalar_lea.vmem [#allocation12], %s907_s29  ;;  %s165_s13 = scalar_lea.vmem [#allocation12], %s1258_s30 }
  0x5f   :  { %v208_v5 = vld [vmem:[%s207_s1] sm:$0x1]  ;;  %199 = vst [vmem:[#allocation2 + $0x6] sm:$0x1] %v198_v4  ;;  %s217_s14 = scalar_lea.vmem [#allocation12], %s1260_s7  ;;  %s229_s15 = scalar_lea.vmem [#allocation12], %s1262_s8 }
  0x60   :  { %209 = vst [vmem:[#allocation2 + $0x7] sm:$0x1] %v208_v5  ;;  %v136_v6 = vld [vmem:[%s135_s6] sm:$0x1]  ;;  %s239_s16 = scalar_lea.vmem [#allocation12], %s1264_s4  ;;  %s249_s17 = scalar_lea.vmem [#allocation12], %s1266_s28 }
  0x61   :  { %v146_v7 = vld [vmem:[%s145_s0] sm:$0x1]  ;;  %137 = vst [vmem:[#allocation2] sm:$0x1] %v136_v6  ;;  %s927_s18 = sld [smem:[#allocation5 + $0x18]]  ;;  %s929_s19 = sld [smem:[#allocation5 + $0x1a]] }
  0x62   :  { %147 = vst [vmem:[#allocation2 + $0x1] sm:$0x1] %v146_v7  ;;  %v156_v8 = vld [vmem:[%s155_s12] sm:$0x1]  ;;  %s931_s3 = sld [smem:[#allocation5 + $0x1c]]  ;;  %s1277_s20 = sld [smem:[#allocation5 + $0x1e]] }
  0x63   :  { %v166_v9 = vld [vmem:[%s165_s13] sm:$0x1]  ;;  %157 = vst [vmem:[#allocation2 + $0x2] sm:$0x1] %v156_v8  ;;  %s1279_s21 = sld [smem:[#allocation5 + $0x1]]  ;;  %s1281_s22 = sld [smem:[#allocation5 + $0x3]] }
  0x64   :  { %167 = vst [vmem:[#allocation2 + $0x3] sm:$0x1] %v166_v9  ;;  %v218_v10 = vld [vmem:[%s217_s14] sm:$0x1]  ;;  %s1283_s23 = sld [smem:[#allocation5 + $0x5]]  ;;  %s1287_s2 = sld [smem:[#allocation5 + $0x7]] }
  0x65   :  { %v230_v11 = vld [vmem:[%s229_s15] sm:$0x1]  ;;  %220 = vst [vmem:[#allocation2 + $0x8] sm:$0x1] %v218_v10  ;;  %s1289_s24 = sld [smem:[#allocation5 + $0x9]]  ;;  %s1293_s25 = sld [smem:[#allocation5 + $0xb]] }
  0x66   :  { %231 = vst [vmem:[#allocation2 + $0x9] sm:$0x1] %v230_v11  ;;  %v240_v12 = vld [vmem:[%s239_s16] sm:$0x1]  ;;  %s1295_s26 = sld [smem:[#allocation5 + $0xd]]  ;;  %s1299_s27 = sld [smem:[#allocation5 + $0xf]] }
  0x67   :  { %v250_v13 = vld [vmem:[%s249_s17] sm:$0x1]  ;;  %241 = vst [vmem:[#allocation2 + $0xa] sm:$0x1] %v240_v12  ;;  %v1285_v14 = vld [vmem:[#allocation2 + $0x4] sm:$0xf] }
  0x68   :  { %251 = vst [vmem:[#allocation2 + $0xb] sm:$0x1] %v250_v13  ;;  %v474_v15 = vmul.f32 %v1285_v14, %v1285_v14  ;;  %s259_s29 = scalar_lea.vmem [#allocation12], %s927_s18  ;;  %s271_s30 = scalar_lea.vmem [#allocation12], %s929_s19 }
  0x69   :  { %v260_v19 = vld [vmem:[%s259_s29] sm:$0x1]  ;;  %s281_s7 = scalar_lea.vmem [#allocation12], %s931_s3  ;;  %s291_s8 = scalar_lea.vmem [#allocation12], %s1277_s20 }
  0x6a   :  { %v485_v17 = vsel %vm481_vm0, %v474_v15, 0.0  ;;  %262 = vst [vmem:[#allocation2 + $0xc] sm:$0x1] %v260_v19  ;;  %v272_v21 = vld [vmem:[%s271_s30] sm:$0x1]  ;;  %s138_s4 = scalar_lea.vmem [#allocation12], %s1279_s21 }
  0x6b   :  { %v1297_v16 = vld [vmem:[#allocation2] sm:$0xf]  ;;  %486 = vadd.xlane.f32.xlu1 %v485_v17  ;;  %273 = vst [vmem:[#allocation2 + $0xd] sm:$0x1] %v272_v21  ;;  %s148_s28 = scalar_lea.vmem [#allocation12], %s1281_s22  ;;  %s158_s9 = scalar_lea.vmem [#allocation12], %s1283_s23 }
  0x6c   :  { %v473_v18 = vmul.f32 %v1297_v16, %v1297_v16  ;;  %v282_v22 = vld [vmem:[%s281_s7] sm:$0x1]  ;;  %s168_s10 = scalar_lea.vmem [#allocation12], %s1287_s2  ;;  %s179_s11 = scalar_lea.vmem [#allocation12], %s1289_s24 }
  0x6d   :  { %283 = vst [vmem:[#allocation2 + $0xe] sm:$0x1] %v282_v22  ;;  %v292_v25 = vld [vmem:[%s291_s8] sm:$0x1]  ;;  %s190_s1 = scalar_lea.vmem [#allocation12], %s1293_s25  ;;  %s200_s6 = scalar_lea.vmem [#allocation12], %s1295_s26 }
  0x6e   :  { %v482_v23 = vsel %vm481_vm0, %v473_v18, 0.0  ;;  %v139_v26 = vld [vmem:[%s138_s4] sm:$0x1]  ;;  %293 = vst [vmem:[#allocation2 + $0xf] sm:$0x1] %v292_v25  ;;  %s210_s0 = scalar_lea.vmem [#allocation12], %s1299_s27 }
  0x6f   :  { %v1304_v20 = vld [vmem:[#allocation2 + $0x8] sm:$0xf]  ;;  %483 = vadd.xlane.f32.xlu0 %v482_v23  ;;  %140 = vst [vmem:[#allocation3] sm:$0x1] %v139_v26  ;;  %v149_v28 = vld [vmem:[%s148_s28] sm:$0x1] }
  0x70   :  { %v475_v24 = vmul.f32 %v1304_v20, %v1304_v20  ;;  %v159_v29 = vld [vmem:[%s158_s9] sm:$0x1]  ;;  %150 = vst [vmem:[#allocation3 + $0x1] sm:$0x1] %v149_v28  ;;  %s935_s12 = sld [smem:[#allocation5 + $0x20]]  ;;  %s937_s13 = sld [smem:[#allocation5 + $0x22]] }
  0x71   :  { %160 = vst [vmem:[#allocation3 + $0x2] sm:$0x1] %v159_v29  ;;  %v169_v30 = vld [vmem:[%s168_s10] sm:$0x1]  ;;  %s939_s14 = sld [smem:[#allocation5 + $0x24]]  ;;  %s1319_s15 = sld [smem:[#allocation5 + $0x26]] }
  0x72   :  { %v488_v27 = vsel %vm481_vm0, %v475_v24, 0.0  ;;  %170 = vst [vmem:[#allocation3 + $0x3] sm:$0x1] %v169_v30  ;;  %v180_v31 = vld [vmem:[%s179_s11] sm:$0x1]  ;;  %s1321_s16 = sld [smem:[#allocation5 + $0x11]] }
  0x73   :  { %489 = vadd.xlane.f32.xlu1 %v488_v27  ;;  %v191_v32 = vld [vmem:[%s190_s1] sm:$0x1]  ;;  %182 = vst [vmem:[#allocation3 + $0x4] sm:$0x1] %v180_v31  ;;  %s1323_s17 = sld [smem:[#allocation5 + $0x13]]  ;;  %s1325_s18 = sld [smem:[#allocation5 + $0x15]] }
  0x74   :  { %192 = vst [vmem:[#allocation3 + $0x5] sm:$0x1] %v191_v32  ;;  %v201_v33 = vld [vmem:[%s200_s6] sm:$0x1]  ;;  %s1329_s19 = sld [smem:[#allocation5 + $0x17]]  ;;  %s1331_s3 = sld [smem:[#allocation5 + $0x28]] }
  0x75   :  { %v211_v34 = vld [vmem:[%s210_s0] sm:$0x1]  ;;  %202 = vst [vmem:[#allocation3 + $0x6] sm:$0x1] %v201_v33  ;;  %v1327_v35 = vld [vmem:[#allocation2 + $0xc] sm:$0xf] }
  0x76   :  { %212 = vst [vmem:[#allocation3 + $0x7] sm:$0x1] %v211_v34  ;;  %v476_v36 = vmul.f32 %v1327_v35, %v1327_v35  ;;  %s1335_s20 = sld [smem:[#allocation5 + $0x2a]]  ;;  %s1337_s21 = sld [smem:[#allocation5 + $0x2c]] }
  0x77   :  { %s1341_s22 = sld [smem:[#allocation5 + $0x2e]]  ;;  %s301_s23 = scalar_lea.vmem [#allocation12], %s935_s12 }
  0x78   :  { %v491_v38 = vsel %vm481_vm0, %v476_v36, 0.0  ;;  %v302_v40 = vld [vmem:[%s301_s23] sm:$0x1]  ;;  %s313_s2 = scalar_lea.vmem [#allocation12], %s937_s13  ;;  %s323_s24 = scalar_lea.vmem [#allocation12], %s939_s14 }
  0x79   :  { %v1339_v37 = vld [vmem:[#allocation3] sm:$0xf]  ;;  %492 = vadd.xlane.f32.xlu0 %v491_v38  ;;  %304 = vst [vmem:[#allocation2 + $0x10] sm:$0x1] %v302_v40  ;;  %s333_s25 = scalar_lea.vmem [#allocation12], %s1319_s15  ;;  %s221_s26 = scalar_lea.vmem [#allocation12], %s1321_s16 }
  0x7a   :  { %v538_v39 = vmul.f32 %v1339_v37, %v1339_v37  ;;  %v314_v42 = vld [vmem:[%s313_s2] sm:$0x1]  ;;  %s232_s27 = scalar_lea.vmem [#allocation12], %s1323_s17  ;;  %s242_s29 = scalar_lea.vmem [#allocation12], %s1325_s18 }
  0x7b   :  { %v324_v43 = vld [vmem:[%s323_s24] sm:$0x1]  ;;  %315 = vst [vmem:[#allocation2 + $0x11] sm:$0x1] %v314_v42  ;;  %s252_s30 = scalar_lea.vmem [#allocation12], %s1329_s19  ;;  %s343_s7 = scalar_lea.vmem [#allocation12], %s1331_s3 }
  0x7c   :  { %v546_v44 = vsel %vm481_vm0, %v538_v39, 0.0  ;;  %325 = vst [vmem:[#allocation2 + $0x12] sm:$0x1] %v324_v43  ;;  %v334_v46 = vld [vmem:[%s333_s25] sm:$0x1]  ;;  %s355_s8 = scalar_lea.vmem [#allocation12], %s1335_s20 }
  0x7d   :  { %v1346_v41 = vld [vmem:[#allocation3 + $0x4] sm:$0xf]  ;;  %547 = vadd.xlane.f32.xlu1 %v546_v44  ;;  %v222_v47 = vld [vmem:[%s221_s26] sm:$0x1]  ;;  %335 = vst [vmem:[#allocation2 + $0x13] sm:$0x1] %v334_v46 }
  0x7e   :  { %v539_v45 = vmul.f32 %v1346_v41, %v1346_v41  ;;  %224 = vst [vmem:[#allocation3 + $0x8] sm:$0x1] %v222_v47  ;;  %v233_v49 = vld [vmem:[%s232_s27] sm:$0x1]  ;;  %s365_s4 = scalar_lea.vmem [#allocation12], %s1337_s21  ;;  %s375_s28 = scalar_lea.vmem [#allocation12], %s1341_s22 }
  0x7f   :  { %v243_v50 = vld [vmem:[%s242_s29] sm:$0x1]  ;;  %234 = vst [vmem:[#allocation3 + $0x9] sm:$0x1] %v233_v49  ;;  %s928_s9 = sld [smem:[#allocation5 + $0x19]]  ;;  %s930_s10 = sld [smem:[#allocation5 + $0x1b]] }
  0x80   :  { %v549_v48 = vsel %vm481_vm0, %v539_v45, 0.0  ;;  %244 = vst [vmem:[#allocation3 + $0xa] sm:$0x1] %v243_v50  ;;  %v253_v51 = vld [vmem:[%s252_s30] sm:$0x1]  ;;  %s932_s11 = sld [smem:[#allocation5 + $0x1d]] }
  0x81   :  { %550 = vadd.xlane.f32.xlu0 %v549_v48  ;;  %254 = vst [vmem:[#allocation3 + $0xb] sm:$0x1] %v253_v51  ;;  %v344_v52 = vld [vmem:[%s343_s7] sm:$0x1]  ;;  %s1361_s1 = sld [smem:[#allocation5 + $0x1f]]  ;;  %s1363_s6 = sld [smem:[#allocation5 + $0x30]] }
  0x82   :  { %v356_v53 = vld [vmem:[%s355_s8] sm:$0x1]  ;;  %346 = vst [vmem:[#allocation2 + $0x14] sm:$0x1] %v344_v52  ;;  %s1365_s0 = sld [smem:[#allocation5 + $0x32]]  ;;  %s1367_s12 = sld [smem:[#allocation5 + $0x34]] }
  0x83   :  { %357 = vst [vmem:[#allocation2 + $0x15] sm:$0x1] %v356_v53  ;;  %v366_v54 = vld [vmem:[%s365_s4] sm:$0x1]  ;;  %s1371_s13 = sld [smem:[#allocation5 + $0x36]]  ;;  %s1373_s14 = sld [smem:[#allocation5 + $0x21]] }
  0x84   :  { %v376_v55 = vld [vmem:[%s375_s28] sm:$0x1]  ;;  %367 = vst [vmem:[#allocation2 + $0x16] sm:$0x1] %v366_v54  ;;  %v1369_v56 = vld [vmem:[#allocation2 + $0x10] sm:$0xf] }
  0x85   :  { %377 = vst [vmem:[#allocation2 + $0x17] sm:$0x1] %v376_v55  ;;  %v477_v57 = vmul.f32 %v1369_v56, %v1369_v56  ;;  %s1377_s15 = sld [smem:[#allocation5 + $0x23]]  ;;  %s1379_s16 = sld [smem:[#allocation5 + $0x25]]  ;;  %v1454_v46 = vld [vmem:[#allocation6] sm:$0xff] }
  0x86   :  { %s1383_s17 = sld [smem:[#allocation5 + $0x27]]  ;;  %s263_s18 = scalar_lea.vmem [#allocation12], %s928_s9  ;;  %v73_v53 = vmul.f32 %v1454_v46, %v1454_v46 }
  0x87   :  { %v494_v59 = vsel %vm481_vm0, %v477_v57, 0.0  ;;  %v264_v61 = vld [vmem:[%s263_s18] sm:$0x1]  ;;  %s274_s19 = scalar_lea.vmem [#allocation12], %s930_s10  ;;  %s284_s3 = scalar_lea.vmem [#allocation12], %s932_s11  ;;  %v1464_v57 = vld [vmem:[#allocation9] sm:$0xff] }
  0x88   :  { %v1381_v58 = vld [vmem:[#allocation3 + $0x8] sm:$0xf]  ;;  %495 = vadd.xlane.f32.xlu1 %v494_v59  ;;  %266 = vst [vmem:[#allocation3 + $0xc] sm:$0x1] %v264_v61  ;;  %v275_v63 = vld [vmem:[%s274_s19] sm:$0x1]  ;;  %v80_v59 = vmul.f32 %v1464_v57, %v1464_v57 }
  0x89   :  { %v540_v60 = vmul.f32 %v1381_v58, %v1381_v58  ;;  %v285_v1 = vld [vmem:[%s284_s3] sm:$0x1]  ;;  %276 = vst [vmem:[#allocation3 + $0xd] sm:$0x1] %v275_v63  ;;  %s294_s20 = scalar_lea.vmem [#allocation12], %s1361_s1  ;;  %s385_s21 = scalar_lea.vmem [#allocation12], %s1363_s6 }
  0x8a   :  { %286 = vst [vmem:[#allocation3 + $0xe] sm:$0x1] %v285_v1  ;;  %v295_v4 = vld [vmem:[%s294_s20] sm:$0x1]  ;;  %s397_s22 = scalar_lea.vmem [#allocation12], %s1365_s0  ;;  %s407_s23 = scalar_lea.vmem [#allocation12], %s1367_s12 }
  0x8b   :  { %v552_v2 = vsel %vm481_vm0, %v540_v60, 0.0  ;;  %v386_v5 = vld [vmem:[%s385_s21] sm:$0x1]  ;;  %296 = vst [vmem:[#allocation3 + $0xf] sm:$0x1] %v295_v4  ;;  %s417_s2 = scalar_lea.vmem [#allocation12], %s1371_s13 }
  0x8c   :  { %v1388_v62 = vld [vmem:[#allocation2 + $0x14] sm:$0xf]  ;;  %553 = vadd.xlane.f32.xlu0 %v552_v2  ;;  %388 = vst [vmem:[#allocation2 + $0x18] sm:$0x1] %v386_v5  ;;  %v398_v7 = vld [vmem:[%s397_s22] sm:$0x1] }
  0x8d   :  { %v478_v3 = vmul.f32 %v1388_v62, %v1388_v62  ;;  %v408_v8 = vld [vmem:[%s407_s23] sm:$0x1]  ;;  %399 = vst [vmem:[#allocation2 + $0x19] sm:$0x1] %v398_v7  ;;  %s305_s24 = scalar_lea.vmem [#allocation12], %s1373_s14  ;;  %s316_s25 = scalar_lea.vmem [#allocation12], %s1377_s15 }
  0x8e   :  { %409 = vst [vmem:[#allocation2 + $0x1a] sm:$0x1] %v408_v8  ;;  %v418_v9 = vld [vmem:[%s417_s2] sm:$0x1]  ;;  %s326_s26 = scalar_lea.vmem [#allocation12], %s1379_s16  ;;  %s336_s27 = scalar_lea.vmem [#allocation12], %s1383_s17 }
  0x8f   :  { %v497_v6 = vsel %vm481_vm0, %v478_v3, 0.0  ;;  %419 = vst [vmem:[#allocation2 + $0x1b] sm:$0x1] %v418_v9  ;;  %v306_v10 = vld [vmem:[%s305_s24] sm:$0x1]  ;;  %s959_s29 = sld [smem:[#allocation5 + $0x38]] }
  0x90   :  { %498 = vadd.xlane.f32.xlu1 %v497_v6  ;;  %v317_v11 = vld [vmem:[%s316_s25] sm:$0x1]  ;;  %308 = vst [vmem:[#allocation3 + $0x10] sm:$0x1] %v306_v10  ;;  %s961_s30 = sld [smem:[#allocation5 + $0x3a]]  ;;  %s963_s7 = sld [smem:[#allocation5 + $0x3c]]  ;;  %v599_v6 = vlaneseq }
  0x91   :  { %318 = vst [vmem:[#allocation3 + $0x11] sm:$0x1] %v317_v11  ;;  %v327_v12 = vld [vmem:[%s326_s26] sm:$0x1]  ;;  %s1403_s8 = sld [smem:[#allocation5 + $0x3e]]  ;;  %s1405_s4 = sld [smem:[#allocation5 + $0x29]] }
  0x92   :  { %v337_v13 = vld [vmem:[%s336_s27] sm:$0x1]  ;;  %328 = vst [vmem:[#allocation3 + $0x12] sm:$0x1] %v327_v12  ;;  %s1407_s28 = sld [smem:[#allocation5 + $0x2b]]  ;;  %s1409_s9 = sld [smem:[#allocation5 + $0x2d]] }
  0x93   :  { %338 = vst [vmem:[#allocation3 + $0x13] sm:$0x1] %v337_v13  ;;  %v1411_v15 = vld [vmem:[#allocation3 + $0xc] sm:$0xf]  ;;  %s1413_s10 = sld [smem:[#allocation5 + $0x2f]]  ;;  %s1415_s11 = sld [smem:[#allocation5 + $0x31]] }
  0x94   :  { %v541_v17 = vmul.f32 %v1411_v15, %v1411_v15  ;;  %s1419_s1 = sld [smem:[#allocation5 + $0x33]]  ;;  %s1421_s6 = sld [smem:[#allocation5 + $0x35]]  ;;  %v1159_v4 = vmov 1966171168   ;;  %v1474_v9 = vshrl.u32 %v599_v6, 7 }
  0x95   :  { %s1425_s0 = sld [smem:[#allocation5 + $0x37]]  ;;  %s427_s12 = scalar_lea.vmem [#allocation12], %s959_s29  ;;  %v597_v5 = vunpack.c.l.s4 %v1159_v4 }
  0x96   :  { %v1423_v18 = vld [vmem:[#allocation2 + $0x18] sm:$0xf]  ;;  %v555_v19 = vsel %vm481_vm0, %v541_v17, 0.0  ;;  %v428_v22 = vld [vmem:[%s427_s12] sm:$0x1]  ;;  %s439_s13 = scalar_lea.vmem [#allocation12], %s961_s30 }
  0x97   :  { %v479_v21 = vmul.f32 %v1423_v18, %v1423_v18  ;;  %556 = vadd.xlane.f32.xlu0 %v555_v19  ;;  %430 = vst [vmem:[#allocation2 + $0x1c] sm:$0x1] %v428_v22  ;;  %v440_v24 = vld [vmem:[%s439_s13] sm:$0x1]  ;;  %s449_s14 = scalar_lea.vmem [#allocation12], %s963_s7  ;;  %s459_s15 = scalar_lea.vmem [#allocation12], %s1403_s8  ;;  %v598_v8 = vunpack.c.0.s8 %v597_v5 }
  0x98   :  { %v450_v25 = vld [vmem:[%s449_s14] sm:$0x1]  ;;  %441 = vst [vmem:[#allocation2 + $0x1d] sm:$0x1] %v440_v24  ;;  %s347_s16 = scalar_lea.vmem [#allocation12], %s1405_s4  ;;  %s358_s17 = scalar_lea.vmem [#allocation12], %s1407_s28 }
  0x99   :  { %v500_v26 = vsel %vm481_vm0, %v479_v21, 0.0  ;;  %451 = vst [vmem:[#allocation2 + $0x1e] sm:$0x1] %v450_v25  ;;  %v460_v28 = vld [vmem:[%s459_s15] sm:$0x1]  ;;  %s368_s18 = scalar_lea.vmem [#allocation12], %s1409_s9  ;;  %v1480_v19 = vsub.s32 %v598_v8, %v1474_v9 }
  0x9a   :  { %v1430_v23 = vld [vmem:[#allocation3 + $0x10] sm:$0xf]  ;;  %501 = vadd.xlane.f32.xlu1 %v500_v26  ;;  %v348_v29 = vld [vmem:[%s347_s16] sm:$0x1]  ;;  %461 = vst [vmem:[#allocation2 + $0x1f] sm:$0x1] %v460_v28 }
  0x9b   :  { %v542_v27 = vmul.f32 %v1430_v23, %v1430_v23  ;;  %350 = vst [vmem:[#allocation3 + $0x14] sm:$0x1] %v348_v29  ;;  %v359_v31 = vld [vmem:[%s358_s17] sm:$0x1]  ;;  %s378_s19 = scalar_lea.vmem [#allocation12], %s1413_s10  ;;  %s389_s3 = scalar_lea.vmem [#allocation12], %s1415_s11 }
  0x9c   :  { %v369_v32 = vld [vmem:[%s368_s18] sm:$0x1]  ;;  %360 = vst [vmem:[#allocation3 + $0x15] sm:$0x1] %v359_v31  ;;  %s400_s20 = scalar_lea.vmem [#allocation12], %s1419_s1  ;;  %s410_s21 = scalar_lea.vmem [#allocation12], %s1421_s6 }
  0x9d   :  { %v558_v30 = vsel %vm481_vm0, %v542_v27, 0.0  ;;  %370 = vst [vmem:[#allocation3 + $0x16] sm:$0x1] %v369_v32  ;;  %v379_v33 = vld [vmem:[%s378_s19] sm:$0x1]  ;;  %s420_s22 = scalar_lea.vmem [#allocation12], %s1425_s0 }
  0x9e   :  { %559 = vadd.xlane.f32.xlu0 %v558_v30  ;;  %380 = vst [vmem:[#allocation3 + $0x17] sm:$0x1] %v379_v33  ;;  %v390_v34 = vld [vmem:[%s389_s3] sm:$0x1]  ;;  %s960_s23 = sld [smem:[#allocation5 + $0x39]]  ;;  %s962_s2 = sld [smem:[#allocation5 + $0x3b]] }
  0x9f   :  { %v401_v36 = vld [vmem:[%s400_s20] sm:$0x1]  ;;  %392 = vst [vmem:[#allocation3 + $0x18] sm:$0x1] %v390_v34  ;;  %s964_s24 = sld [smem:[#allocation5 + $0x3d]]  ;;  %s966_s25 = sld [smem:[#allocation5 + $0x3f]] }
  0xa0   :  { %402 = vst [vmem:[#allocation3 + $0x19] sm:$0x1] %v401_v36  ;;  %v411_v38 = vld [vmem:[%s410_s21] sm:$0x1]  ;;  %v1486_v31 = vsub.s32 0, %v1474_v9  ;;  %vm813_vm9 = vcmp.eq.s32.totalorder %v1474_v9, 0 }
  0xa1   :  { %v421_v39 = vld [vmem:[%s420_s22] sm:$0x1]  ;;  %412 = vst [vmem:[#allocation3 + $0x1a] sm:$0x1] %v411_v38  ;;  %v1445_v40 = vld [vmem:[#allocation2 + $0x1c] sm:$0xf] }
  0xa2   :  { %422 = vst [vmem:[#allocation3 + $0x1b] sm:$0x1] %v421_v39  ;;  %v480_v42 = vmul.f32 %v1445_v40, %v1445_v40  ;;  %s1160_s10 = smov [#allocation14]  }
  0xa3   :  { %s829_s11 = sshll.u32 %s1160_s10, 4  ;;  %s830_s11 = int_to_ptr.vmem [resolvable:$true] %s829_s11 }
  0xa4   :  { %v503_v44 = vsel %vm481_vm0, %v480_v42, 0.0  ;;  %s431_s26 = scalar_lea.vmem [#allocation12], %s960_s23  ;;  %s442_s27 = scalar_lea.vmem [#allocation12], %s962_s2 }
  0xa5   :  { %v1449_v43 = vld [vmem:[#allocation3 + $0x14] sm:$0xf]  ;;  %v432_v47 = vld [vmem:[%s431_s26] sm:$0x1]  ;;  %504 = vadd.xlane.f32.xlu1 %v503_v44  ;;  %s452_s29 = scalar_lea.vmem [#allocation12], %s964_s24  ;;  %s462_s30 = scalar_lea.vmem [#allocation12], %s966_s25 }
  0xa6   :  { %v543_v45 = vmul.f32 %v1449_v43, %v1449_v43  ;;  %434 = vst [vmem:[#allocation3 + $0x1c] sm:$0x1] %v432_v47  ;;  %v443_v49 = vld [vmem:[%s442_s27] sm:$0x1]  ;;  %s1120_s6 = scalar_lea.vmem %s830_s11, 128  ;;  %p1125_p8 = scmp.lt.s32.totalorder %s830_s11, %s830_s11 }
  0xa7   :  { %v453_v50 = vld [vmem:[%s452_s29] sm:$0x1]  ;;  %444 = vst [vmem:[#allocation3 + $0x1d] sm:$0x1] %v443_v49  ;;  %p1121_p7 = scmp.ne.s32.totalorder %s830_s11, %s1120_s6  ;;  %p1126_p9 = scmp.lt.s32.totalorder %s1120_s6, %s1120_s6 }
  0xa8   :  { %v561_v51 = vsel %vm481_vm0, %v543_v45, 0.0  ;;  %454 = vst [vmem:[#allocation3 + $0x1e] sm:$0x1] %v453_v50  ;;  %v463_v54 = vld [vmem:[%s462_s30] sm:$0x1] }
  0xa9   :  { %v1456_v48 = vld [vmem:[#allocation3 + $0x18] sm:$0xf]  ;;  %562 = vadd.xlane.f32.xlu0 %v561_v51  ;;  %464 = vst [vmem:[#allocation3 + $0x1f] sm:$0x1] %v463_v54  ;;  %p1127_p10 = por %p1126_p9, %p1125_p8 }
  0xaa   :  { %v544_v52 = vmul.f32 %v1456_v48, %v1456_v48 }
  0xab   :  { %p1128_p11 = pnand %p1127_p10, %p1121_p7 }
  0xac   :  { %v564_v55 = vsel %vm481_vm0, %v544_v52, 0.0 }
  0xad   :  { %565 = vadd.xlane.f32.xlu1 %v564_v55  ;;  %74 = vadd.xlane.f32.xlu0 %v73_v53 }
  0xb0   :  { %v1468_v60 = vld [vmem:[#allocation3 + $0x1c] sm:$0xf] }
  0xb1   :  { %81 = vadd.xlane.f32.xlu0 %v80_v59  ;;  %v545_v61 = vmul.f32 %v1468_v60, %v1468_v60 }
  0xb3   :  { %v567_v63 = vsel %vm481_vm0, %v545_v61, 0.0 }
  0xb4   :  { %568 = vadd.xlane.f32.xlu1 %v567_v63 }
  0xe5   :  { %v89_v1 = vpop.xlane.xlu0 %88 }
  0xe6   :  { %v90_v2 = vmax.f32 %v89_v1, 1e-24 }
  0xe8   :  { %984 = vrsqrt.f32 %v90_v2 }
  0xf2   :  { %v985_v10 = vpop.eup %984 }
  0xf3   :  { %v1477_v17 = vmul.f32 %v985_v10, %v1268_v0 }
  0xf5   :  { %v602_v24 = vrot.slane %v1477_v17, %v1480_v19 }
  0xf7   :  { %v610_v28 = vcombine.high %v602_v24, %v602_v24  ;;  %v618_v29 = vrot.slane %v602_v24, %v1480_v19 }
  0xf8   :  { %v487_v3 = vpop.xlane.xlu1 %486 }
  0xf9   :  { %v507_v13 = vmax.f32 %v487_v3, 1e-24  ;;  %v632_v32 = vrot.slane %v610_v28, %v1480_v19  ;;  %v647_v36 = vrot.slane %v618_v29, %v1486_v31  ;;  %v640_v63 = vcombine.high %v618_v29, %v618_v29 }
  0xfb   :  { %v651_v39 = vrot.slane %v632_v32, %v1486_v31 }
  0xfc   :  { %v484_v7 = vpop.xlane.xlu0 %483 }
  0xfd   :  { %v506_v11 = vmax.f32 %v484_v7, 1e-24 }
  0xff   :  { %986 = vrsqrt.f32 %v506_v11 }
 0x100   :  { %v490_v12 = vpop.xlane.xlu1 %489  ;;  %988 = vrsqrt.f32 %v507_v13 }
 0x101   :  { %v508_v30 = vmax.f32 %v490_v12, 1e-24 }
 0x106   :  { %v493_v21 = vpop.xlane.xlu0 %492 }
 0x107   :  { %v509_v55 = vmax.f32 %v493_v21, 1e-24  ;;  %v595_v21 = vcombine.high %v1477_v17, %v1477_v17 }
 0x109   :  { %v987_v0 = vpop.eup %986  ;;  %v609_v28 = vrot.slane %v595_v21, %v1480_v19 }
 0x10a   :  { %v548_v22 = vpop.xlane.xlu1 %547  ;;  %v989_v33 = vpop.eup %988  ;;  %v522_v34 = vmul.f32 %v987_v0, %v1297_v16 }
 0x10b   :  { %v570_v25 = vmax.f32 %v548_v22, 1e-24  ;;  %v523_v38 = vmul.f32 %v989_v33, %v1285_v14 }
 0x10c   :  { %v684_v47 = vadd.f32 %v647_v36, %v522_v34  ;;  %v625_v34 = vrot.slane %v609_v28, %v1480_v19 }
 0x10d   :  { %990 = vrsqrt.f32 %v570_v25  ;;  %v685_v53 = vadd.f32 %v651_v39, %v523_v38  ;;  %v642_v25 = vcombine.high %v632_v32, %v632_v32 }
 0x10e   :  { %v551_v26 = vpop.xlane.xlu0 %550 }
 0x10f   :  { %v571_v27 = vmax.f32 %v551_v26, 1e-24  ;;  %v659_v0 = vrot.slane %v642_v25, %v1486_v31 }
 0x111   :  { %992 = vrsqrt.f32 %v571_v27 }
 0x112   :  { %994 = vrsqrt.f32 %v508_v30 }
 0x115   :  { %v496_v59 = vpop.xlane.xlu1 %495 }
 0x116   :  { %v510_v2 = vmax.f32 %v496_v59, 1e-24  ;;  %v611_v59 = vcombine.high %v609_v28, %v609_v28 }
 0x117   :  { %v991_v42 = vpop.eup %990 }
 0x118   :  { %v586_v45 = vmul.f32 %v991_v42, %v1339_v37 }
 0x119   :  { %v554_v44 = vpop.xlane.xlu0 %553 }
 0x11a   :  { %v572_v50 = vmax.f32 %v554_v44, 1e-24  ;;  %v692_v51 = vsub.f32 %v684_v47, %v586_v45  ;;  %v663_v47 = vrot.slane %v625_v34, %v1486_v31 }
 0x11b   :  { %v993_v49 = vpop.eup %992 }
 0x11c   :  { %v587_v52 = vmul.f32 %v993_v49, %v1346_v41  ;;  %996 = vrsqrt.f32 %v572_v50  ;;  %v700_v16 = vand.u32 2147483647, %v692_v51  ;;  %v995_v1 = vpop.eup %994  ;;  %v655_v41 = vrot.slane %v640_v63, %v1486_v31 }
 0x11d   :  { %998 = vrsqrt.f32 %v509_v55  ;;  %v524_v3 = vmul.f32 %v995_v1, %v1304_v20  ;;  %v499_v8 = vpop.xlane.xlu1 %498 }
 0x11e   :  { %v693_v54 = vsub.f32 %v685_v53, %v587_v52  ;;  %v708_v14 = vsel %vm481_vm0, %v700_v16, 0.0  ;;  %1000 = vrsqrt.f32 %v510_v2  ;;  %v511_v29 = vmax.f32 %v499_v8, 1e-24 }
 0x11f   :  { %709 = vadd.xlane.f32.xlu1 %v708_v14  ;;  %v686_v11 = vadd.f32 %v655_v41, %v524_v3 }
 0x120   :  { %v701_v61 = vand.u32 2147483647, %v693_v54 }
 0x122   :  { %v711_v37 = vsel %vm481_vm0, %v701_v61, 0.0 }
 0x123   :  { %712 = vadd.xlane.f32.xlu0 %v711_v37 }
 0x124   :  { %v557_v4 = vpop.xlane.xlu0 %556 }
 0x125   :  { %v573_v7 = vmax.f32 %v557_v4, 1e-24  ;;  %v641_v4 = vcombine.high %v625_v34, %v625_v34 }
 0x126   :  { %v997_v5 = vpop.eup %996 }
 0x127   :  { %v588_v10 = vmul.f32 %v997_v5, %v1381_v58  ;;  %1002 = vrsqrt.f32 %v573_v7  ;;  %v999_v20 = vpop.eup %998  ;;  %v502_v26 = vpop.xlane.xlu1 %501 }
 0x128   :  { %v525_v58 = vmul.f32 %v999_v20, %v1327_v35  ;;  %v1001_v30 = vpop.eup %1000  ;;  %v512_v33 = vmax.f32 %v502_v26, 1e-24 }
 0x129   :  { %v694_v13 = vsub.f32 %v686_v11, %v588_v10  ;;  %v526_v42 = vmul.f32 %v1001_v30, %v1369_v56 }
 0x12a   :  { %v687_v39 = vadd.f32 %v659_v0, %v525_v58 }
 0x12b   :  { %v560_v12 = vpop.xlane.xlu0 %559  ;;  %v702_v24 = vand.u32 2147483647, %v694_v13  ;;  %v688_v53 = vadd.f32 %v663_v47, %v526_v42 }
 0x12c   :  { %v574_v22 = vmax.f32 %v560_v12, 1e-24 }
 0x12d   :  { %v714_v27 = vsel %vm481_vm0, %v702_v24, 0.0 }
 0x12e   :  { %1004 = vrsqrt.f32 %v574_v22  ;;  %715 = vadd.xlane.f32.xlu1 %v714_v27 }
 0x12f   :  { %1006 = vrsqrt.f32 %v511_v29 }
 0x130   :  { %1008 = vrsqrt.f32 %v512_v33 }
 0x131   :  { %v1003_v36 = vpop.eup %1002 }
 0x132   :  { %v505_v32 = vpop.xlane.xlu1 %504  ;;  %v589_v38 = vmul.f32 %v1003_v36, %v1411_v15 }
 0x133   :  { %v513_v56 = vmax.f32 %v505_v32, 1e-24 }
 0x134   :  { %v695_v45 = vsub.f32 %v687_v39, %v589_v38 }
 0x136   :  { %v563_v44 = vpop.xlane.xlu0 %562  ;;  %v703_v51 = vand.u32 2147483647, %v695_v45 }
 0x137   :  { %v575_v49 = vmax.f32 %v563_v44, 1e-24 }
 0x138   :  { %v1005_v35 = vpop.eup %1004  ;;  %v717_v15 = vsel %vm481_vm0, %v703_v51, 0.0 }
 0x139   :  { %v590_v52 = vmul.f32 %v1005_v35, %v1430_v23  ;;  %1010 = vrsqrt.f32 %v575_v49  ;;  %718 = vadd.xlane.f32.xlu0 %v717_v15  ;;  %v1007_v63 = vpop.eup %1006  ;;  %v639_v23 = vrot.slane %v611_v59, %v1480_v19  ;;  %v671_v19 = vrot.slane %v641_v4, %v1486_v31 }
 0x13a   :  { %v566_v50 = vpop.xlane.xlu1 %565  ;;  %v75_v54 = vpop.xlane.xlu0 %74  ;;  %v527_v41 = vmul.f32 %v1007_v63, %v1388_v62 }
 0x13b   :  { %v576_v16 = vmax.f32 %v566_v50, 1e-24  ;;  %v696_v55 = vsub.f32 %v688_v53, %v590_v52  ;;  %v76_v14 = vmax.f32 %v75_v54, 1e-24  ;;  %v1009_v2 = vpop.eup %1008  ;;  %v667_v7 = vrot.slane %v639_v23, %v1486_v31 }
 0x13c   :  { %v528_v8 = vmul.f32 %v1009_v2, %v1423_v18  ;;  %v643_v58 = vcombine.high %v639_v23, %v639_v23  ;;  %v1532_v50 = vand.u32 127, %v599_v6 }
 0x13d   :  { %1012 = vrsqrt.f32 %v576_v16  ;;  %v704_v61 = vand.u32 2147483647, %v696_v55  ;;  %v689_v13 = vadd.f32 %v667_v7, %v527_v41 }
 0x13e   :  { %1014 = vrsqrt.f32 %v76_v14  ;;  %v82_v1 = vpop.xlane.xlu0 %81  ;;  %v690_v62 = vadd.f32 %v671_v19, %v528_v8  ;;  %v675_v34 = vrot.slane %v643_v58, %v1486_v31  ;;  %v753_v53 = vsub.s32 %v1532_v50, %v1474_v9 }
 0x13f   :  { %v720_v37 = vsel %vm481_vm0, %v704_v61, 0.0  ;;  %1016 = vrsqrt.f32 %v513_v56  ;;  %v83_v3 = vmax.f32 %v82_v1, 1e-24  ;;  %vm814_vm10 = vcmp.eq.s32.totalorder %v1532_v50, 0 }
 0x140   :  { %721 = vadd.xlane.f32.xlu1 %v720_v37  ;;  %vm818_vm11 = vcmp.eq.s32.totalorder %v1532_v50, 1  ;;  %vm815_vm12 = vmand %vm813_vm9, %vm814_vm10 }
 0x141   :  { %1018 = vrsqrt.f32 %v83_v3  ;;  %v569_v5 = vpop.xlane.xlu1 %568  ;;  %vm819_vm13 = vmand %vm813_vm9, %vm818_vm11 }
 0x142   :  { %v577_v11 = vmax.f32 %v569_v5, 1e-24 }
 0x143   :  { %v1011_v10 = vpop.eup %1010 }
 0x144   :  { %v591_v12 = vmul.f32 %v1011_v10, %v1449_v43  ;;  %1020 = vrsqrt.f32 %v577_v11 }
 0x146   :  { %v697_v22 = vsub.f32 %v689_v13, %v591_v12 }
 0x147   :  { %v1013_v21 = vpop.eup %1012 }
 0x148   :  { %v592_v24 = vmul.f32 %v1013_v21, %v1456_v48  ;;  %v1015_v25 = vpop.eup %1014  ;;  %v705_v20 = vand.u32 2147483647, %v697_v22 }
 0x149   :  { %v78_v27 = vmul.f32 %v1015_v25, %v1454_v46  ;;  %v1017_v28 = vpop.eup %1016 }
 0x14a   :  { %v698_v26 = vsub.f32 %v690_v62, %v592_v24  ;;  %v723_v18 = vsel %vm481_vm0, %v705_v20, 0.0  ;;  %v529_v30 = vmul.f32 %v1017_v28, %v1445_v40 }
 0x14b   :  { %v1019_v43 = vpop.eup %1018  ;;  %724 = vadd.xlane.f32.xlu0 %v723_v18  ;;  %v93_v48 = vadd.f32 %v1477_v17, %v78_v27  ;;  %v99_v40 = vmul.f32 %v78_v27, %v78_v27 }
 0x14c   :  { %v706_v29 = vand.u32 2147483647, %v698_v26  ;;  %v85_v33 = vmul.f32 %v1019_v43, %v1464_v57  ;;  %v691_v38 = vadd.f32 %v675_v34, %v529_v30  ;;  %v120_v57 = vmul.f32 %v1477_v17, %v1477_v17 }
 0x14e   :  { %v726_v0 = vsel %vm481_vm0, %v706_v29, 0.0  ;;  %v94_v36 = vsub.f32 %v93_v48, %v85_v33  ;;  %v1021_v46 = vpop.eup %1020  ;;  %v109_v45 = vmul.f32 %v85_v33, %v85_v33 }
 0x14f   :  { %727 = vadd.xlane.f32.xlu1 %v726_v0  ;;  %v593_v32 = vmul.f32 %v1021_v46, %v1468_v60 }
 0x150   :  { %v95_v39 = vand.u32 2147483647, %v94_v36 }
 0x151   :  { %v699_v42 = vsub.f32 %v691_v38, %v593_v32 }
 0x153   :  { %96 = vadd.xlane.f32.xlu1 %v95_v39  ;;  %v707_v44 = vand.u32 2147483647, %v699_v42 }
 0x155   :  { %v729_v47 = vsel %vm481_vm0, %v707_v44, 0.0 }
 0x156   :  { %730 = vadd.xlane.f32.xlu0 %v729_v47 }
 0x157   :  { %110 = vadd.xlane.f32.xlu1 %v109_v45 }
 0x15a   :  { %100 = vadd.xlane.f32.xlu0 %v99_v40 }
 0x15e   :  { %121 = vadd.xlane.f32.xlu0 %v120_v57 }
 0x1ac   :  { %v710_v31 = vpop.xlane.xlu1 %709 }
 0x1ad   :  { %v732_v16 = vsub.f32 0.0, %v710_v31 }
 0x1af   :  { %v754_v17 = vrot.slane %v732_v16, %v753_v53 }
 0x1b0   :  { %v713_v49 = vpop.xlane.xlu0 %712 }
 0x1b1   :  { %v733_v54 = vsub.f32 0.0, %v713_v49 }
 0x1b3   :  { %v758_v14 = vrot.slane %v733_v54, %v753_v53 }
 0x1b5   :  { %v784_v3 = vsel %vm783_vm1, %v758_v14, %v754_v17 }
 0x1bb   :  { %v716_v35 = vpop.xlane.xlu1 %715 }
 0x1bc   :  { %v734_v15 = vsub.f32 0.0, %v716_v35 }
 0x1be   :  { %v762_v1 = vrot.slane %v734_v15, %v753_v53 }
 0x1c0   :  { %v786_v5 = vsel %vm785_vm2, %v762_v1, %v784_v3 }
 0x1c6   :  { %v719_v51 = vpop.xlane.xlu0 %718 }
 0x1c7   :  { %v735_v59 = vsub.f32 0.0, %v719_v51 }
 0x1c9   :  { %v766_v6 = vrot.slane %v735_v59, %v753_v53 }
 0x1cb   :  { %v788_v11 = vsel %vm787_vm3, %v766_v6, %v786_v5 }
 0x1cd   :  { %v722_v60 = vpop.xlane.xlu1 %721 }
 0x1ce   :  { %v736_v56 = vsub.f32 0.0, %v722_v60 }
 0x1d0   :  { %v770_v23 = vrot.slane %v736_v56, %v753_v53 }
 0x1d2   :  { %v790_v13 = vsel %vm789_vm4, %v770_v23, %v788_v11 }
 0x1d8   :  { %v725_v55 = vpop.xlane.xlu0 %724 }
 0x1d9   :  { %v737_v61 = vsub.f32 0.0, %v725_v55 }
 0x1db   :  { %v774_v41 = vrot.slane %v737_v61, %v753_v53 }
 0x1dc   :  { %v728_v52 = vpop.xlane.xlu1 %727 }
 0x1dd   :  { %v738_v37 = vsub.f32 0.0, %v728_v52  ;;  %v792_v22 = vsel %vm791_vm5, %v774_v41, %v790_v13 }
 0x1df   :  { %v778_v7 = vrot.slane %v738_v37, %v753_v53 }
 0x1e0   :  { %v97_v63 = vpop.xlane.xlu1 %96 }
 0x1e1   :  { %v98_v2 = vsub.f32 0.0, %v97_v63  ;;  %v794_v20 = vsel %vm793_vm6, %v778_v7, %v792_v22 }
 0x1e3   :  { %v731_v8 = vpop.xlane.xlu0 %730  ;;  %v740_v19 = vsub.f32 1.0, %v98_v2 }
 0x1e4   :  { %v111_v4 = vpop.xlane.xlu1 %110  ;;  %v739_v12 = vsub.f32 0.0, %v731_v8 }
 0x1e5   :  { %v112_v10 = vrot.slane %v111_v4, 4 }
 0x1e6   :  { %v782_v24 = vrot.slane %v739_v12, %v753_v53 }
 0x1e7   :  { %v113_v21 = vadd.f32 %v112_v10, %v111_v4  ;;  %v101_v25 = vpop.xlane.xlu0 %100 }
 0x1e8   :  { %v102_v26 = vrot.slane %v101_v25, 4  ;;  %v796_v27 = vsel %vm795_vm7, %v782_v24, %v794_v20 }
 0x1e9   :  { %v114_v62 = vrot.slane %v113_v21, 2  ;;  %v798_v28 = vadd.f32 %v796_v27, %v740_v19 }
 0x1ea   :  { %v103_v29 = vadd.f32 %v102_v26, %v101_v25 }
 0x1eb   :  { %v115_v18 = vadd.f32 %v114_v62, %v113_v21  ;;  %v122_v58 = vpop.xlane.xlu0 %121  ;;  %v799_v43 = vmax.f32 %v798_v28, 0.0 }
 0x1ec   :  { %v104_v0 = vrot.slane %v103_v29, 2  ;;  %v123_v30 = vrot.slane %v122_v58, 4 }
 0x1ed   :  { %v801_v33 = vsel %vm800_vm8, %v799_v43, 0.0  ;;  %v116_v48 = vrot.slane %v115_v18, 1 }
 0x1ee   :  { %v124_v34 = vadd.f32 %v123_v30, %v122_v58  ;;  %802 = vadd.xlane.f32.xlu1 %v801_v33  ;;  %v105_v36 = vadd.f32 %v104_v0, %v103_v29 }
 0x1ef   :  { %v117_v38 = vadd.f32 %v116_v48, %v115_v18 }
 0x1f0   :  { %v125_v46 = vrot.slane %v124_v34, 2  ;;  %v106_v32 = vrot.slane %v105_v36, 1 }
 0x1f2   :  { %v126_v39 = vadd.f32 %v125_v46, %v124_v34  ;;  %v107_v42 = vadd.f32 %v106_v32, %v105_v36 }
 0x1f4   :  { %967 = vpush %v107_v42  ;;  %v127_v44 = vrot.slane %v126_v39, 1 }
 0x1f5   :  { %969 = vpush %v117_v38 }
 0x1f6   :  { %v128_v45 = vadd.f32 %v127_v44, %v126_v39 }
 0x1f8   :  { %971 = vpush %v128_v45 }
 0x225   :  { %s968_s7 = spop %967 }
 0x226   :  { %s970_s8 = spop %969 }
 0x227   :  { %s119_s28 = sadd.f32 %s970_s8, %s968_s7 }
 0x229   :  { %s972_s4 = spop %971 }
 0x22a   :  { %s130_s9 = sadd.f32 %s972_s4, %s119_s28 }
 0x22c   :  { %v820_v52 = vstv %s130_s9 }
 0x27b   :  { %v803_v47 = vpop.xlane.xlu1 %802 }
 0x27c   :  { %v804_v40 = vrot.slane %v803_v47, 4 }
 0x27e   :  { %v805_v57 = vadd.f32 %v804_v40, %v803_v47 }
 0x280   :  { %v806_v31 = vrot.slane %v805_v57, 2 }
 0x282   :  { %v807_v35 = vadd.f32 %v806_v31, %v805_v57 }
 0x284   :  { %v808_v49 = vrot.slane %v807_v35, 1 }
 0x286   :  { %v809_v60 = vadd.f32 %v808_v49, %v807_v35 }
 0x288   :  { %973 = vpush %v809_v60 }
 0x2b9   :  { %s974_s1 = spop %973 }
 0x2ba   :  { %v816_v51 = vstv %s974_s1 }
 0x2bb   :  { %v817_v53 = vsel %vm815_vm12, %v816_v51, 0.0 }
 0x2bc   :  { %v821_v16 = vsel %vm819_vm13, %v820_v52, %v817_v53 }
 0x2bd   :  { %822 = vst [vmem:[#allocation14] sm:$0xff] %v821_v16 }
 0x2be   :  { %1131 = shalt.err (!%p1128_p11)
}
 0x2bf   :  { %s1132_s13 = scalar_lea.hbm %s1556_s5, 128 }
 0x2c0   :  { %p1133_p12 = scmp.ne.s32.totalorder %s1556_s5, %s1132_s13  ;;  %p1136_p13 = scmp.lt.u32.totalorder %s1132_s13, %s1556_s5 }
 0x2c2   :  { %p1138_p0 = pnand %p1136_p13, %p1133_p12 }
 0x2c4   :  { %1141 = shalt.err (!%p1138_p0)
}
 0x2c5   :  { %832 = dma.vmem_to_hbm [thread:$0]  %s830_s11, 128, %s1556_s5, [#allocation8]  }
 0x2c6   :  { %1150 = dma.done.wait [#allocation8], 128  }
 0x2c7   :  { %1151 = vsyncadd [#allocation8], 4294967168 }
 0x2c8   :  { %836 = vsyncpa [#allocation7], 1 }
 0x2c9   :  { %837 = vsyncpa [#allocation10], 1 }
 0x2ca   :  { %838 = vsyncpa [#allocation13], 1 }
 0x2cb   :  { %839 = vsyncpa [#allocation8], 1 }

</bundles_post_ra>
